<compile_context>
chip_gen: v7x
topology: tpu7x:2x2x1
jax: 0.10.0
libtpu: 0.0.40
codegen_flags: <defaults>
</compile_context>

<pallas_src>
import jax
import jax.numpy as jnp
from jax import lax
from jax.experimental import pallas as pl
from jax.experimental.pallas import tpu as pltpu

# ----- small, module-consistent config -----
B = 2                 # batch
T = 16                # time steps
NC = 4                # num_codebooks
BT = 8                # backtranslation_dim
D = NC * BT           # conformer attention dim = 32
CS = 256              # codebook_size (module default 1024; reduced for a small demo)
SPK = 64              # utt_embed_dim (module default 512; reduced for a small demo)
PAD_ID = CS + 5       # padding_id = codebook_size + 5
DPAD = 64             # classifier in-features padded: max is D + (NC-1)*BT = 56 -> 64
ATT = 128             # attention_dimension (only used for init std, as in the torch module)
R = B * T             # rows processed by the single-program kernel


# ---------------------------------------------------------------------------
# Kernel bodies
# ---------------------------------------------------------------------------
def _contextualize(emb_ref, bias_ref, wctx_ref):
    # TODO(synk): the real module runs a 6-block Conformer decoder (MHA, macaron FFN,
    # utt-embedding-conditioned LayerNorm) whose source is not provided here; a
    # deterministic linear+tanh contextualizer stand-in is used for this step.
    # Wctx / bias are zero-padded to DPAD, so pad lanes come out as tanh(0) == 0 and the
    # result is directly the register-resident feature block [context | 0 ... 0].
    return jnp.tanh(
        jnp.dot(emb_ref[...], wctx_ref[...], preferred_element_type=jnp.float32)
        + bias_ref[...])                                                      # (R, DPAD)


def _hierarchical_heads(feat, wcls_ref, bcls_ref, btpad_ref, emit):
    """Shared hierarchical-classifier loop; `feat` is an (R, DPAD) register value."""
    rows = feat.shape[0]
    lane = lax.broadcasted_iota(jnp.int32, (rows, CS), 1)
    for h in range(NC):
        # zero-padded rows of wcls[h] / zero pad lanes of feat make the full
        # (R, DPAD) @ (DPAD, CS) matmul equal to the per-head torch Linear(D + h*BT, CS).
        logits = jnp.dot(feat, wcls_ref[h],
                         preferred_element_type=jnp.float32) + bcls_ref[h]    # (R, CS)
        emit(h, logits)
        if h + 1 < NC:
            # argmax -> backtranslation lookup as a one-hot matmul; btpad[h] already places
            # the BT embedding columns at lanes [D + h*BT, D + (h+1)*BT), zeros elsewhere,
            # so a plain add scatters it into the (previously zero) lanes of feat.
            idx = jnp.argmax(logits, axis=-1)                                  # (R,)
            onehot = (lane == idx[:, None]).astype(jnp.float32)                # (R, CS)
            feat = feat + jnp.dot(onehot, btpad_ref[h],
                                  preferred_element_type=jnp.float32)          # (R, DPAD)


def _refine_infer_kernel(emb_ref, bias_ref, wctx_ref, wcls_ref, bcls_ref, btpad_ref,
                         out_ref):
    feat = _contextualize(emb_ref, bias_ref, wctx_ref)

    def emit(h, logits):
        out_ref[:, h * CS:(h + 1) * CS] = logits                  # 256-lane dense store

    _hierarchical_heads(feat, wcls_ref, bcls_ref, btpad_ref, emit)


def _refine_train_kernel(emb_ref, bias_ref, wctx_ref, wcls_ref, bcls_ref, btpad_ref,
                         gold_ref, w_ref, loss_ref):
    # Fused MaskedRefinementObjective: logits never leave VMEM/vregs.
    feat = _contextualize(emb_ref, bias_ref, wctx_ref)
    rows = feat.shape[0]
    lane = lax.broadcasted_iota(jnp.int32, (rows, CS), 1)
    gold = gold_ref[...]                                          # (R, NC) int32
    ce_parts = []

    def emit(h, logits):
        # gold is one-hot => soft CE == logsumexp(logits) - logits[gold]
        mx = jnp.max(logits, axis=-1, keepdims=True)
        lse = mx + jnp.log(jnp.sum(jnp.exp(logits - mx), axis=-1, keepdims=True))
        gold_oh = (lane == gold[:, h:h + 1]).astype(jnp.float32)
        gold_logit = jnp.sum(logits * gold_oh, axis=-1, keepdims=True)
        ce_parts.append(lse - gold_logit)                         # (R, 1)

    _hierarchical_heads(feat, wcls_ref, bcls_ref, btpad_ref, emit)

    ce = ce_parts[0]
    for p in ce_parts[1:]:
        ce = ce + p
    loss_ref[...] = jnp.sum(ce * w_ref[...], axis=(0, 1), keepdims=True)


# ---------------------------------------------------------------------------
# Parameters (deterministic synthetic init, shapes from the module __init__)
# ---------------------------------------------------------------------------
def init_params(key):
    k = jax.random.split(key, 6)
    std = ATT ** (-0.5)
    # backtranslation_heads: NC embeddings of shape (padding_id + 1, BT)
    bt_full = jax.random.normal(k[0], (NC, PAD_ID + 1, BT), jnp.float32) * std
    # hierarchical_classifier: Linear(D + h*BT, CS), stored transposed & zero-padded to DPAD
    wcls = jnp.zeros((NC, DPAD, CS), jnp.float32)
    kk = jax.random.split(k[1], NC)
    for h in range(NC):
        width = D + h * BT
        wcls = wcls.at[h, :width, :].set(
            jax.random.normal(kk[h], (width, CS), jnp.float32) * (width ** -0.5))
    bcls = jax.random.normal(k[2], (NC, 1, CS), jnp.float32) * 0.01
    # stand-in contextualizer parameters
    wctx = jax.random.normal(k[3], (D, D), jnp.float32) * (D ** -0.5)
    wspk = jax.random.normal(k[4], (SPK, D), jnp.float32) * (SPK ** -0.5)
    bctx = jax.random.normal(k[5], (1, D), jnp.float32) * 0.01
    return dict(bt_full=bt_full, wcls=wcls, bcls=bcls, wctx=wctx, wspk=wspk, bctx=bctx)


# ---------------------------------------------------------------------------
# Forward (Pallas-backed)
# ---------------------------------------------------------------------------
def _full_block(shape):
    zeros = (0,) * len(shape)
    return pl.BlockSpec(shape, lambda i, _z=zeros: _z)


def _codec_refinement_forward(params, index_sequence, is_inference, speaker_embedding,
                              padding_mask=None, gold_one_hot=None):
    bt_full = params["bt_full"]

    if not is_inference:
        idx = jnp.where(padding_mask[:, None, :], PAD_ID, index_sequence)
    else:
        idx = index_sequence

    # indexes_per_codebook_to_stacked_embedding_vector (embedding gather stays in XLA;
    # the torch module uses the *backtranslation* embeddings here, input_embeddings unused)
    stacked = jnp.concatenate(
        [jnp.take(bt_full[c], idx[:, c, :], axis=0) for c in range(NC)], axis=-1)  # (B,T,D)
    emb_flat = stacked.reshape(R, D).astype(jnp.float32)

    # hoisted speaker projection -> per-row bias, zero-padded to DPAD
    bias = (speaker_embedding.astype(jnp.float32) @ params["wspk"]) + params["bctx"]  # (B,D)
    bias_flat = jnp.broadcast_to(bias[:, None, :], (B, T, D)).reshape(R, D)
    bias_pad = jnp.pad(bias_flat, ((0, 0), (0, DPAD - D)))
    wctx_pad = jnp.pad(params["wctx"], ((0, 0), (0, DPAD - D)))

    # backtranslation tables placed into each head's lane range of the DPAD feature block
    btpad = jnp.zeros((NC, CS, DPAD), jnp.float32)
    for h in range(NC):
        btpad = btpad.at[h, :, D + h * BT: D + (h + 1) * BT].set(bt_full[h, :CS, :])

    common_inputs = (emb_flat, bias_pad, wctx_pad, params["wcls"], params["bcls"], btpad)
    common_specs = [
        _full_block((R, D)),
        _full_block((R, DPAD)),
        _full_block((D, DPAD)),
        _full_block((NC, DPAD, CS)),
        _full_block((NC, 1, CS)),
        _full_block((NC, CS, DPAD)),
    ]

    if is_inference:
        logits_all = pl.pallas_call(
            _refine_infer_kernel,
            out_shape=jax.ShapeDtypeStruct((R, NC * CS), jnp.float32),
            grid=(1,),
            in_specs=common_specs,
            out_specs=_full_block((R, NC * CS)),
            compiler_params=pltpu.CompilerParams(dimension_semantics=("arbitrary",)),
        )(*common_inputs)
        # torch: cat(dim=2) -> view(B,T,NC,CS) -> transpose chain -> [NC, B, CS, T]
        return jnp.transpose(logits_all.reshape(B, T, NC, CS), (2, 0, 3, 1))

    # ------------------- fused MaskedRefinementObjective -------------------
    non_pad = jnp.logical_not(padding_mask).astype(jnp.float32)                 # (B, T)
    # (the torch F.pad on the mask is a no-op when time dimensions already match)
    weights = non_pad / jnp.sum(non_pad, axis=1, keepdims=True) / float(B * CS)
    w_flat = weights.reshape(R, 1)
    # gold assumed one-hot (as in the torch usage) -> ship indices instead of the one-hot block
    gold_idx = jnp.argmax(gold_one_hot, axis=-1).astype(jnp.int32)              # (B, NC, T)
    gold_flat = jnp.transpose(gold_idx, (0, 2, 1)).reshape(R, NC)

    loss = pl.pallas_call(
        _refine_train_kernel,
        out_shape=jax.ShapeDtypeStruct((1, 1), jnp.float32),
        grid=(1,),
        in_specs=common_specs + [_full_block((R, NC)), _full_block((R, 1))],
        out_specs=_full_block((1, 1)),
        compiler_params=pltpu.CompilerParams(dimension_semantics=("arbitrary",)),
    )(*common_inputs, gold_flat, w_flat)[0, 0]
    return (loss, loss)


codec_refinement_forward = jax.jit(_codec_refinement_forward, static_argnums=(2,))


# ---------------------------------------------------------------------------
# Pure-JAX reference (same stand-in contextualizer) for correctness checking
# ---------------------------------------------------------------------------
def reference_forward(params, index_sequence, is_inference, speaker_embedding,
                      padding_mask=None, gold_one_hot=None):
    bt_full = params["bt_full"]
    idx = index_sequence if is_inference else jnp.where(
        padding_mask[:, None, :], PAD_ID, index_sequence)
    stacked = jnp.concatenate(
        [jnp.take(bt_full[c], idx[:, c, :], axis=0) for c in range(NC)], axis=-1)
    ctx = jnp.tanh(stacked @ params["wctx"]
                   + (speaker_embedding @ params["wspk"])[:, None, :]
                   + params["bctx"][None])
    feat = ctx
    logits_list = []
    for h in range(NC):
        width = D + h * BT
        logits = feat @ params["wcls"][h, :width, :] + params["bcls"][h]
        logits_list.append(logits)
        pred_idx = jnp.argmax(logits, axis=-1)
        backtr = jnp.take(bt_full[h, :CS, :], pred_idx, axis=0)
        feat = jnp.concatenate([feat, backtr], axis=-1)
    indexes = jnp.concatenate(logits_list, axis=-1).reshape(B, T, NC, CS)
    indexes = jnp.transpose(indexes, (2, 0, 3, 1))
    if is_inference:
        return indexes
    non_pad = jnp.logical_not(padding_mask)
    logp = jax.nn.log_softmax(jnp.transpose(indexes, (0, 1, 3, 2)), axis=-1)
    gold_t = jnp.transpose(gold_one_hot, (1, 0, 2, 3)).astype(jnp.float32)
    ce = jnp.sum(-jnp.sum(gold_t * logp, axis=-1), axis=0)        # (B, T)
    mask_f = non_pad.astype(jnp.float32)
    w = mask_f / jnp.sum(mask_f, axis=1, keepdims=True) / float(B * CS)
    loss = jnp.sum(ce * w * mask_f)
    return (loss, loss)


if __name__ == "__main__":
    key = jax.random.PRNGKey(0)
    kp, k1, k2, k3 = jax.random.split(key, 4)
    params = init_params(kp)

    index_sequence = jax.random.randint(k1, (B, NC, T), 0, CS, dtype=jnp.int32)
    speaker_embedding = jax.random.normal(k2, (B, SPK), jnp.float32)
    # batch 0: no padding, batch 1: last 4 frames padded
    padding_mask = jnp.arange(T)[None, :] >= jnp.array([T, T - 4])[:, None]
    gold_idx = jax.random.randint(k3, (B, NC, T), 0, CS, dtype=jnp.int32)
    gold_one_hot = jax.nn.one_hot(gold_idx, CS, dtype=jnp.float32)   # (B, NC, T, CS)

    # inference path: refined logits [NC, B, CS, T]
    refined = codec_refinement_forward(params, index_sequence, True, speaker_embedding)
    refined = jax.block_until_ready(refined)
    ref_out = reference_forward(params, index_sequence, True, speaker_embedding)
    assert refined.shape == (NC, B, CS, T)
    assert jnp.allclose(refined, ref_out, atol=1e-4, rtol=1e-4)

    # training path: masked refinement loss (scalar, returned twice)
    loss, loss2 = codec_refinement_forward(params, index_sequence, False, speaker_embedding,
                                           padding_mask=padding_mask,
                                           gold_one_hot=gold_one_hot)
    loss = jax.block_until_ready(loss)
    ref_loss, _ = reference_forward(params, index_sequence, False, speaker_embedding,
                                    padding_mask=padding_mask, gold_one_hot=gold_one_hot)
    assert jnp.allclose(loss, ref_loss, atol=1e-4, rtol=1e-4)
    assert jnp.allclose(loss, loss2)

    print("KERNEL_OK")
</pallas_src>

<mosaic_0001>
module attributes {stable_mosaic.version = 11 : i64} {
  func.func @_refine_infer_kernel(%arg0: i32, %arg1: memref<32x32xf32, #tpu.memory_space<vmem>>, %arg2: memref<32x64xf32, #tpu.memory_space<vmem>>, %arg3: memref<32x64xf32, #tpu.memory_space<vmem>>, %arg4: memref<4x64x256xf32, #tpu.memory_space<vmem>>, %arg5: memref<4x1x256xf32, #tpu.memory_space<vmem>>, %arg6: memref<4x256x64xf32, #tpu.memory_space<vmem>>, %arg7: memref<32x1024xf32, #tpu.memory_space<vmem>>) attributes {dimension_semantics = [#tpu.dimension_semantics<arbitrary>], iteration_bounds = array<i64: 1>, scalar_prefetch = 0 : i64, scratch_operands = 0 : i64, tpu.core_type = #tpu.core_type<tc>, window_params = [{pipeline_mode = #tpu.pipeline_mode<synchronous>, transform_indices = @transform_0, window_bounds = array<i64: 32, 32>}, {pipeline_mode = #tpu.pipeline_mode<synchronous>, transform_indices = @transform_1, window_bounds = array<i64: 32, 64>}, {pipeline_mode = #tpu.pipeline_mode<synchronous>, transform_indices = @transform_2, window_bounds = array<i64: 32, 64>}, {pipeline_mode = #tpu.pipeline_mode<synchronous>, transform_indices = @transform_3, window_bounds = array<i64: 4, 64, 256>}, {pipeline_mode = #tpu.pipeline_mode<synchronous>, transform_indices = @transform_4, window_bounds = array<i64: 4, 1, 256>}, {pipeline_mode = #tpu.pipeline_mode<synchronous>, transform_indices = @transform_5, window_bounds = array<i64: 4, 256, 64>}, {pipeline_mode = #tpu.pipeline_mode<synchronous>, transform_indices = @transform_6, window_bounds = array<i64: 32, 1024>}]} {
    %c0 = arith.constant 0 : index
    %c0_0 = arith.constant 0 : index
    %0 = vector.load %arg1[%c0, %c0_0] : memref<32x32xf32, #tpu.memory_space<vmem>>, vector<32x32xf32>
    %c0_1 = arith.constant 0 : index
    %c0_2 = arith.constant 0 : index
    %1 = vector.load %arg3[%c0_1, %c0_2] : memref<32x64xf32, #tpu.memory_space<vmem>>, vector<32x64xf32>
    %cst = arith.constant dense<0.000000e+00> : vector<32x64xf32>
    %2 = tpu.matmul %0, %1, %cst {dimension_numbers = #tpu.dot_dimension_numbers<[1], [0], [0], [1], [0, 0, 1, 1], [], []>} : vector<32x32xf32>, vector<32x64xf32>, vector<32x64xf32> -> vector<32x64xf32>
    %c0_3 = arith.constant 0 : index
    %c0_4 = arith.constant 0 : index
    %3 = vector.load %arg2[%c0_3, %c0_4] : memref<32x64xf32, #tpu.memory_space<vmem>>, vector<32x64xf32>
    %4 = arith.addf %2, %3 : vector<32x64xf32>
    %5 = math.tanh %4 : vector<32x64xf32>
    %6 = tpu.iota {dimensions = array<i32: 1>} : vector<32x256xi32>
    %c0_5 = arith.constant 0 : index
    %c0_6 = arith.constant 0 : index
    %c0_7 = arith.constant 0 : index
    %7 = vector.load %arg4[%c0_5, %c0_6, %c0_7] : memref<4x64x256xf32, #tpu.memory_space<vmem>>, vector<1x64x256xf32>
    %8 = vector.shape_cast %7 : vector<1x64x256xf32> to vector<64x256xf32>
    %cst_8 = arith.constant dense<0.000000e+00> : vector<32x256xf32>
    %9 = tpu.matmul %5, %8, %cst_8 {dimension_numbers = #tpu.dot_dimension_numbers<[1], [0], [0], [1], [0, 0, 1, 1], [], []>} : vector<32x64xf32>, vector<64x256xf32>, vector<32x256xf32> -> vector<32x256xf32>
    %c0_9 = arith.constant 0 : index
    %c0_10 = arith.constant 0 : index
    %c0_11 = arith.constant 0 : index
    %10 = vector.load %arg5[%c0_9, %c0_10, %c0_11] : memref<4x1x256xf32, #tpu.memory_space<vmem>>, vector<1x1x256xf32>
    %11 = vector.shape_cast %10 : vector<1x1x256xf32> to vector<1x256xf32>
    %12 = vector.broadcast %11 : vector<1x256xf32> to vector<32x256xf32>
    %13 = arith.addf %9, %12 : vector<32x256xf32>
    %c0_12 = arith.constant 0 : index
    %c0_13 = arith.constant 0 : index
    %14 = vector.load %arg7[%c0_12, %c0_13] : memref<32x1024xf32, #tpu.memory_space<vmem>>, vector<32x256xf32>
    tpu.vector_store %arg7[%c0_12, %c0_13], %13 {strides = array<i32>} : memref<32x1024xf32, #tpu.memory_space<vmem>>, vector<32x256xf32>,
    %15 = tpu.reduce_index %13 {axis = 1 : i32, kind = #tpu.reduction_kind<arg_max>} : vector<32x256xf32> -> vector<32xi32>
    %16 = vector.shape_cast %15 : vector<32xi32> to vector<32x1xi32>
    %17 = vector.broadcast %16 : vector<32x1xi32> to vector<32x256xi32>
    %18 = arith.cmpi eq, %6, %17 : vector<32x256xi32>
    %19 = arith.extui %18 : vector<32x256xi1> to vector<32x256xi32>
    %20 = arith.sitofp %19 : vector<32x256xi32> to vector<32x256xf32>
    %c0_14 = arith.constant 0 : index
    %c0_15 = arith.constant 0 : index
    %c0_16 = arith.constant 0 : index
    %21 = vector.load %arg6[%c0_14, %c0_15, %c0_16] : memref<4x256x64xf32, #tpu.memory_space<vmem>>, vector<1x256x64xf32>
    %22 = vector.shape_cast %21 : vector<1x256x64xf32> to vector<256x64xf32>
    %cst_17 = arith.constant dense<0.000000e+00> : vector<32x64xf32>
    %23 = tpu.matmul %20, %22, %cst_17 {dimension_numbers = #tpu.dot_dimension_numbers<[1], [0], [0], [1], [0, 0, 1, 1], [], []>} : vector<32x256xf32>, vector<256x64xf32>, vector<32x64xf32> -> vector<32x64xf32>
    %24 = arith.addf %5, %23 : vector<32x64xf32>
    %c1 = arith.constant 1 : index
    %c0_18 = arith.constant 0 : index
    %c0_19 = arith.constant 0 : index
    %25 = vector.load %arg4[%c1, %c0_18, %c0_19] : memref<4x64x256xf32, #tpu.memory_space<vmem>>, vector<1x64x256xf32>
    %26 = vector.shape_cast %25 : vector<1x64x256xf32> to vector<64x256xf32>
    %cst_20 = arith.constant dense<0.000000e+00> : vector<32x256xf32>
    %27 = tpu.matmul %24, %26, %cst_20 {dimension_numbers = #tpu.dot_dimension_numbers<[1], [0], [0], [1], [0, 0, 1, 1], [], []>} : vector<32x64xf32>, vector<64x256xf32>, vector<32x256xf32> -> vector<32x256xf32>
    %c1_21 = arith.constant 1 : index
    %c0_22 = arith.constant 0 : index
    %c0_23 = arith.constant 0 : index
    %28 = vector.load %arg5[%c1_21, %c0_22, %c0_23] : memref<4x1x256xf32, #tpu.memory_space<vmem>>, vector<1x1x256xf32>
    %29 = vector.shape_cast %28 : vector<1x1x256xf32> to vector<1x256xf32>
    %30 = vector.broadcast %29 : vector<1x256xf32> to vector<32x256xf32>
    %31 = arith.addf %27, %30 : vector<32x256xf32>
    %c0_24 = arith.constant 0 : index
    %c256 = arith.constant 256 : index
    %32 = vector.load %arg7[%c0_24, %c256] : memref<32x1024xf32, #tpu.memory_space<vmem>>, vector<32x256xf32>
    tpu.vector_store %arg7[%c0_24, %c256], %31 {strides = array<i32>} : memref<32x1024xf32, #tpu.memory_space<vmem>>, vector<32x256xf32>,
    %33 = tpu.reduce_index %31 {axis = 1 : i32, kind = #tpu.reduction_kind<arg_max>} : vector<32x256xf32> -> vector<32xi32>
    %34 = vector.shape_cast %33 : vector<32xi32> to vector<32x1xi32>
    %35 = vector.broadcast %34 : vector<32x1xi32> to vector<32x256xi32>
    %36 = arith.cmpi eq, %6, %35 : vector<32x256xi32>
    %37 = arith.extui %36 : vector<32x256xi1> to vector<32x256xi32>
    %38 = arith.sitofp %37 : vector<32x256xi32> to vector<32x256xf32>
    %c1_25 = arith.constant 1 : index
    %c0_26 = arith.constant 0 : index
    %c0_27 = arith.constant 0 : index
    %39 = vector.load %arg6[%c1_25, %c0_26, %c0_27] : memref<4x256x64xf32, #tpu.memory_space<vmem>>, vector<1x256x64xf32>
    %40 = vector.shape_cast %39 : vector<1x256x64xf32> to vector<256x64xf32>
    %cst_28 = arith.constant dense<0.000000e+00> : vector<32x64xf32>
    %41 = tpu.matmul %38, %40, %cst_28 {dimension_numbers = #tpu.dot_dimension_numbers<[1], [0], [0], [1], [0, 0, 1, 1], [], []>} : vector<32x256xf32>, vector<256x64xf32>, vector<32x64xf32> -> vector<32x64xf32>
    %42 = arith.addf %24, %41 : vector<32x64xf32>
    %c2 = arith.constant 2 : index
    %c0_29 = arith.constant 0 : index
    %c0_30 = arith.constant 0 : index
    %43 = vector.load %arg4[%c2, %c0_29, %c0_30] : memref<4x64x256xf32, #tpu.memory_space<vmem>>, vector<1x64x256xf32>
    %44 = vector.shape_cast %43 : vector<1x64x256xf32> to vector<64x256xf32>
    %cst_31 = arith.constant dense<0.000000e+00> : vector<32x256xf32>
    %45 = tpu.matmul %42, %44, %cst_31 {dimension_numbers = #tpu.dot_dimension_numbers<[1], [0], [0], [1], [0, 0, 1, 1], [], []>} : vector<32x64xf32>, vector<64x256xf32>, vector<32x256xf32> -> vector<32x256xf32>
    %c2_32 = arith.constant 2 : index
    %c0_33 = arith.constant 0 : index
    %c0_34 = arith.constant 0 : index
    %46 = vector.load %arg5[%c2_32, %c0_33, %c0_34] : memref<4x1x256xf32, #tpu.memory_space<vmem>>, vector<1x1x256xf32>
    %47 = vector.shape_cast %46 : vector<1x1x256xf32> to vector<1x256xf32>
    %48 = vector.broadcast %47 : vector<1x256xf32> to vector<32x256xf32>
    %49 = arith.addf %45, %48 : vector<32x256xf32>
    %c0_35 = arith.constant 0 : index
    %c512 = arith.constant 512 : index
    %50 = vector.load %arg7[%c0_35, %c512] : memref<32x1024xf32, #tpu.memory_space<vmem>>, vector<32x256xf32>
    tpu.vector_store %arg7[%c0_35, %c512], %49 {strides = array<i32>} : memref<32x1024xf32, #tpu.memory_space<vmem>>, vector<32x256xf32>,
    %51 = tpu.reduce_index %49 {axis = 1 : i32, kind = #tpu.reduction_kind<arg_max>} : vector<32x256xf32> -> vector<32xi32>
    %52 = vector.shape_cast %51 : vector<32xi32> to vector<32x1xi32>
    %53 = vector.broadcast %52 : vector<32x1xi32> to vector<32x256xi32>
    %54 = arith.cmpi eq, %6, %53 : vector<32x256xi32>
    %55 = arith.extui %54 : vector<32x256xi1> to vector<32x256xi32>
    %56 = arith.sitofp %55 : vector<32x256xi32> to vector<32x256xf32>
    %c2_36 = arith.constant 2 : index
    %c0_37 = arith.constant 0 : index
    %c0_38 = arith.constant 0 : index
    %57 = vector.load %arg6[%c2_36, %c0_37, %c0_38] : memref<4x256x64xf32, #tpu.memory_space<vmem>>, vector<1x256x64xf32>
    %58 = vector.shape_cast %57 : vector<1x256x64xf32> to vector<256x64xf32>
    %cst_39 = arith.constant dense<0.000000e+00> : vector<32x64xf32>
    %59 = tpu.matmul %56, %58, %cst_39 {dimension_numbers = #tpu.dot_dimension_numbers<[1], [0], [0], [1], [0, 0, 1, 1], [], []>} : vector<32x256xf32>, vector<256x64xf32>, vector<32x64xf32> -> vector<32x64xf32>
    %60 = arith.addf %42, %59 : vector<32x64xf32>
    %c3 = arith.constant 3 : index
    %c0_40 = arith.constant 0 : index
    %c0_41 = arith.constant 0 : index
    %61 = vector.load %arg4[%c3, %c0_40, %c0_41] : memref<4x64x256xf32, #tpu.memory_space<vmem>>, vector<1x64x256xf32>
    %62 = vector.shape_cast %61 : vector<1x64x256xf32> to vector<64x256xf32>
    %cst_42 = arith.constant dense<0.000000e+00> : vector<32x256xf32>
    %63 = tpu.matmul %60, %62, %cst_42 {dimension_numbers = #tpu.dot_dimension_numbers<[1], [0], [0], [1], [0, 0, 1, 1], [], []>} : vector<32x64xf32>, vector<64x256xf32>, vector<32x256xf32> -> vector<32x256xf32>
    %c3_43 = arith.constant 3 : index
    %c0_44 = arith.constant 0 : index
    %c0_45 = arith.constant 0 : index
    %64 = vector.load %arg5[%c3_43, %c0_44, %c0_45] : memref<4x1x256xf32, #tpu.memory_space<vmem>>, vector<1x1x256xf32>
    %65 = vector.shape_cast %64 : vector<1x1x256xf32> to vector<1x256xf32>
    %66 = vector.broadcast %65 : vector<1x256xf32> to vector<32x256xf32>
    %67 = arith.addf %63, %66 : vector<32x256xf32>
    %c0_46 = arith.constant 0 : index
    %c768 = arith.constant 768 : index
    %68 = vector.load %arg7[%c0_46, %c768] : memref<32x1024xf32, #tpu.memory_space<vmem>>, vector<32x256xf32>
    tpu.vector_store %arg7[%c0_46, %c768], %67 {strides = array<i32>} : memref<32x1024xf32, #tpu.memory_space<vmem>>, vector<32x256xf32>,
    return
  }
  func.func @transform_0(%arg0: i32) -> (i32, i32) {
    %c0_i32 = arith.constant 0 : i32
    %c0_i32_0 = arith.constant 0 : i32
    %c0_i32_1 = arith.constant 0 : i32
    return %c0_i32, %c0_i32_0 : i32, i32
  }
  func.func @transform_1(%arg0: i32) -> (i32, i32) {
    %c0_i32 = arith.constant 0 : i32
    %c0_i32_0 = arith.constant 0 : i32
    %c0_i32_1 = arith.constant 0 : i32
    return %c0_i32, %c0_i32_0 : i32, i32
  }
  func.func @transform_2(%arg0: i32) -> (i32, i32) {
    %c0_i32 = arith.constant 0 : i32
    %c0_i32_0 = arith.constant 0 : i32
    %c0_i32_1 = arith.constant 0 : i32
    return %c0_i32, %c0_i32_0 : i32, i32
  }
  func.func @transform_3(%arg0: i32) -> (i32, i32, i32) {
    %c0_i32 = arith.constant 0 : i32
    %c0_i32_0 = arith.constant 0 : i32
    %c0_i32_1 = arith.constant 0 : i32
    %c0_i32_2 = arith.constant 0 : i32
    return %c0_i32, %c0_i32_0, %c0_i32_1 : i32, i32, i32
  }
  func.func @transform_4(%arg0: i32) -> (i32, i32, i32) {
    %c0_i32 = arith.constant 0 : i32
    %c0_i32_0 = arith.constant 0 : i32
    %c0_i32_1 = arith.constant 0 : i32
    %c0_i32_2 = arith.constant 0 : i32
    return %c0_i32, %c0_i32_0, %c0_i32_1 : i32, i32, i32
  }
  func.func @transform_5(%arg0: i32) -> (i32, i32, i32) {
    %c0_i32 = arith.constant 0 : i32
    %c0_i32_0 = arith.constant 0 : i32
    %c0_i32_1 = arith.constant 0 : i32
    %c0_i32_2 = arith.constant 0 : i32
    return %c0_i32, %c0_i32_0, %c0_i32_1 : i32, i32, i32
  }
  func.func @transform_6(%arg0: i32) -> (i32, i32) {
    %c0_i32 = arith.constant 0 : i32
    %c0_i32_0 = arith.constant 0 : i32
    %c0_i32_1 = arith.constant 0 : i32
    return %c0_i32, %c0_i32_0 : i32, i32
  }
}

</mosaic_0001>

<bundles_post_ra>
// kernel: _codec_refinement_forward.1
= control target key start
LH: loop header
LB: loop body
LE: loop exit
PB: predicated region body
PF: predicated region fallthrough
CT: control target
= control target key end

     0   :  { %vm35_vm0 = vcmask 261120   ;;  %v1760_v33 = vmov 0.0   ;;  %vm168_vm1 = vcmask 523264   ;;  %v137_v51 = vlaneseq  ;;  %s2788_s2 = inlined_call_operand.vmem [shape: f32[32,64], index: 2, kind: input, shape index: {}]   ;;  %s2789_s0 = inlined_call_operand.vmem [shape: f32[32,32], index: 0, kind: input, shape index: {}]   ;;  %s2790_s3 = inlined_call_operand.vmem [shape: f32[4,64,256], index: 3, kind: input, shape index: {}]   ;;  %s2791_s1 = inlined_call_operand.vmem [shape: f32[32,64], index: 1, kind: input, shape index: {}]   ;;  %s2792_s4 = inlined_call_operand.vmem [shape: f32[4,1,256], index: 4, kind: input, shape index: {}]   ;;  %s2793_s6 = inlined_call_operand.vmem [shape: f32[32,1024], index: 6, kind: output, shape index: {}]   ;;  %s2794_s5 = inlined_call_operand.vmem [shape: f32[4,256,64], index: 5, kind: input, shape index: {}]  }
   0x1   :  { %v27_v0 = vld [vmem:[%s2788_s2] sm:$0xff]  ;;  %v28_v1 = vld [vmem:[%s2788_s2 + $0x8] sm:$0xff]  ;;  %v29_v2 = vld [vmem:[%s2788_s2 + $0x10] sm:$0xff]  ;;  %245 = vmatprep.mubr.f32.mxu1 %v1760_v33 }
   0x2   :  { %v1569_v3 = vpack.c.bf16 %v28_v1, %v27_v0  ;;  %v30_v4 = vld [vmem:[%s2788_s2 + $0x18] sm:$0xff]  ;;  %v23_v5 = vld [vmem:[%s2789_s0] sm:$0xff]  ;;  %v141_v7 = vld [vmem:[%s2790_s3 + $0x8] sm:$0xff]  ;;  %v159_v52 = vshrl.u32 %v137_v51, 7 }
   0x3   :  { %v1573_v6 = vpack.c.bf16 %v30_v4, %v29_v2  ;;  %1563 = vmatprep.mubr.msk.f32.mxu0 %vm35_vm0, %v23_v5  ;;  %v143_v8 = vld [vmem:[%s2790_s3 + $0x18] sm:$0xff]  ;;  %v24_v10 = vld [vmem:[%s2789_s0 + $0x8] sm:$0xff]  ;;  %v25_v11 = vld [vmem:[%s2789_s0 + $0x10] sm:$0xff] }
   0x4   :  { %1570 = vmatprep.subr.bf16.mxu0 %v1569_v3  ;;  %v1577_v9 = vpack.c.bf16 %v143_v8, %v141_v7  ;;  %v26_v12 = vld [vmem:[%s2789_s0 + $0x18] sm:$0xff]  ;;  %v140_v13 = vld [vmem:[%s2790_s3] sm:$0xff]  ;;  %v142_v14 = vld [vmem:[%s2790_s3 + $0x10] sm:$0xff]  ;;  %v1907_v53 = vsub.s32 0, %v159_v52  ;;  %v1912_v55 = vsub.s32 1, %v159_v52 }
   0x5   :  { %1572 = vmatpush3.bf16.msra.mxu0 %v1569_v3  ;;  %v1579_v15 = vpack.c.bf16 %v142_v14, %v140_v13  ;;  %v145_v16 = vld [vmem:[%s2790_s3 + $0x28] sm:$0xff]  ;;  %v147_v17 = vld [vmem:[%s2790_s3 + $0x38] sm:$0xff]  ;;  %v144_v19 = vld [vmem:[%s2790_s3 + $0x20] sm:$0xff] }
   0x6   :  { %1574 = vmatprep.subr.bf16.mxu0 %v1573_v6  ;;  %1578 = vmatprep.subr.bf16.mxu1 %v1577_v9  ;;  %v1581_v18 = vpack.c.bf16 %v147_v17, %v145_v16  ;;  %v146_v20 = vld [vmem:[%s2790_s3 + $0x30] sm:$0xff]  ;;  %v149_v22 = vld [vmem:[%s2790_s3 + $0x48] sm:$0xff]  ;;  %v151_v23 = vld [vmem:[%s2790_s3 + $0x58] sm:$0xff] }
   0x7   :  { %1580 = vmatpush1.bf16.msra.mxu1 %v1579_v15  ;;  %v1583_v21 = vpack.c.bf16 %v146_v20, %v144_v19  ;;  %v1585_v24 = vpack.c.bf16 %v151_v23, %v149_v22  ;;  %v148_v25 = vld [vmem:[%s2790_s3 + $0x40] sm:$0xff]  ;;  %v150_v26 = vld [vmem:[%s2790_s3 + $0x50] sm:$0xff]  ;;  %v153_v28 = vld [vmem:[%s2790_s3 + $0x68] sm:$0xff] }
   0x8   :  { %1582 = vmatprep.subr.bf16.mxu1 %v1581_v18  ;;  %v1587_v27 = vpack.c.bf16 %v150_v26, %v148_v25  ;;  %v155_v29 = vld [vmem:[%s2790_s3 + $0x78] sm:$0xff]  ;;  %v152_v30 = vld [vmem:[%s2790_s3 + $0x60] sm:$0xff]  ;;  %v154_v32 = vld [vmem:[%s2790_s3 + $0x70] sm:$0xff] }
   0x9   :  { %1576 = vmatpush3.bf16.msra.mxu0 %v1573_v6  ;;  %v1589_v31 = vpack.c.bf16 %v155_v29, %v153_v28  ;;  %v1591_v34 = vpack.c.bf16 %v154_v32, %v152_v30  ;;  %v31_v35 = vld [vmem:[%s2791_s1] sm:$0xff]  ;;  %v32_v37 = vld [vmem:[%s2791_s1 + $0x8] sm:$0xff]  ;;  %v33_v40 = vld [vmem:[%s2791_s1 + $0x10] sm:$0xff] }
   0xa   :  { %v34_v45 = vld [vmem:[%s2791_s1 + $0x18] sm:$0xff]  ;;  %v156_v54 = vld [vmem:[%s2792_s4] sm:$0x3]  ;;  %v351_v15 = vld [vmem:[%s2794_s5 + $0x88] sm:$0xff] }
   0xb   :  { %1584 = vmatpush1.bf16.msra.mxu1 %v1583_v21  ;;  %v161_v56 = vrot.slane %v156_v54, %v1907_v53  ;;  %v165_v57 = vrot.slane %v156_v54, %v1912_v55  ;;  %v350_v14 = vld [vmem:[%s2794_s5 + $0x80] sm:$0xff]  ;;  %v335_v18 = vld [vmem:[%s2794_s5 + $0x8] sm:$0xff]  ;;  %v352_v19 = vld [vmem:[%s2794_s5 + $0x90] sm:$0xff] }
   0xc   :  { %1564 = vmatmul.mubr.msk.f32.vlgmr.msra.gmra.mrb[0].mxu0 %vm35_vm0, %v24_v10  ;;  %1586 = vmatprep.subr.bf16.mxu1 %v1585_v24  ;;  %v334_v16 = vld [vmem:[%s2794_s5] sm:$0xff]  ;;  %v1593_v17 = vpack.c.bf16 %v351_v15, %v350_v14  ;;  %v353_v20 = vld [vmem:[%s2794_s5 + $0x98] sm:$0xff]  ;;  %v336_v23 = vld [vmem:[%s2794_s5 + $0x10] sm:$0xff]  ;;  %v2089_v14 = vand.u32 127, %v137_v51 }
   0xd   :  { %1566 = vmatprep.mubr.msk.f32.mxu0 %vm35_vm0, %v25_v11  ;;  %v1595_v21 = vpack.c.bf16 %v335_v18, %v334_v16  ;;  %v1597_v22 = vpack.c.bf16 %v353_v20, %v352_v19  ;;  %v337_v24 = vld [vmem:[%s2794_s5 + $0x18] sm:$0xff]  ;;  %v354_v25 = vld [vmem:[%s2794_s5 + $0xa0] sm:$0xff]  ;;  %v355_v26 = vld [vmem:[%s2794_s5 + $0xa8] sm:$0xff] }
   0xe   :  { %1594 = vmatprep.subr.bf16.mxu0 %v1593_v17  ;;  %v1601_v28 = vpack.c.bf16 %v355_v26, %v354_v25  ;;  %v338_v29 = vld [vmem:[%s2794_s5 + $0x20] sm:$0xff]  ;;  %v339_v30 = vld [vmem:[%s2794_s5 + $0x28] sm:$0xff]  ;;  %v357_v32 = vld [vmem:[%s2794_s5 + $0xb8] sm:$0xff]  ;;  %v2092_v16 = vadd.s32 128, %v2089_v14 }
   0xf   :  { %1588 = vmatpush1.bf16.msra.mxu1 %v1587_v27  ;;  %1596 = vmatpush3.bf16.msra.mxu0 %v1595_v21  ;;  %v1599_v27 = vpack.c.bf16 %v337_v24, %v336_v23  ;;  %v344_v54 = vld [vmem:[%s2794_s5 + $0x50] sm:$0xff]  ;;  %v1260_v24 = vld [vmem:[%s2790_s3 + $0xa0] sm:$0xff]  ;;  %v1265_v26 = vld [vmem:[%s2790_s3 + $0xc8] sm:$0xff] }
  0x10   :  { %1567 = vmatmul.mubr.msk.f32.gmra.mrb[2].mxu0 %vm35_vm0, %v26_v12  ;;  %1590 = vmatprep.subr.bf16.mxu1 %v1589_v31  ;;  %v356_v31 = vld [vmem:[%s2794_s5 + $0xb0] sm:$0xff] }
  0x11   :  { %1598 = vmatprep.subr.bf16.mxu0 %v1597_v22  ;;  %v1258_v21 = vld [vmem:[%s2790_s3 + $0x90] sm:$0xff] }
  0x12   :  { %v1262_v25 = vld [vmem:[%s2790_s3 + $0xb0] sm:$0xff] }
  0x13   :  { %1592 = vmatpush1.bf16.msra.mxu1 %v1591_v34  ;;  %1600 = vmatpush3.bf16.msra.mxu0 %v1599_v27  ;;  %v1603_v34 = vpack.c.bf16 %v339_v30, %v338_v29  ;;  %v1267_v27 = vld [vmem:[%s2790_s3 + $0xd8] sm:$0xff]  ;;  %v1264_v30 = vld [vmem:[%s2790_s3 + $0xc0] sm:$0xff] }
  0x14   :  { %1602 = vmatprep.subr.bf16.mxu0 %v1601_v28  ;;  %v1631_v28 = vpack.c.bf16 %v1262_v25, %v1260_v24  ;;  %v1633_v29 = vpack.c.bf16 %v1267_v27, %v1265_v26  ;;  %v1301_v24 = vld [vmem:[%s2794_s5 + $0x180] sm:$0xff]  ;;  %v1302_v25 = vld [vmem:[%s2794_s5 + $0x188] sm:$0xff] }
  0x15   :  { %v1285_v26 = vld [vmem:[%s2794_s5 + $0x100] sm:$0xff]  ;;  %v1641_v27 = vpack.c.bf16 %v1302_v25, %v1301_v24  ;;  %v1300_v24 = vld [vmem:[%s2794_s5 + $0x178] sm:$0xff] }
  0x17   :  { %1604 = vmatpush3.bf16.msra.mxu0 %v1603_v34 }
  0xdf   :  { %v1565_v36 = vpop.f32.mrb[0].mxu0 }
  0xe0   :  { %v114_v38 = vpop.f32.mrb[1].mxu0  ;;  %v120_v41 = vadd.f32 %v1565_v36, %v32_v37  ;;  %v340_v36 = vld [vmem:[%s2794_s5 + $0x30] sm:$0xff]  ;;  %v341_v37 = vld [vmem:[%s2794_s5 + $0x38] sm:$0xff] }
  0xe1   :  { %v115_v39 = vadd.f32 %v114_v38, %v31_v35  ;;  %v1605_v35 = vpack.c.bf16 %v357_v32, %v356_v31  ;;  %v358_v38 = vld [vmem:[%s2794_s5 + $0xc0] sm:$0xff]  ;;  %v1266_v31 = vld [vmem:[%s2790_s3 + $0xd0] sm:$0xff] }
  0xe2   :  { %v1635_v32 = vpack.c.bf16 %v1266_v31, %v1264_v30  ;;  %v1304_v30 = vld [vmem:[%s2794_s5 + $0x198] sm:$0xff] }
  0xe3   :  { %1752 = vtanh.f32 %v115_v39  ;;  %v1568_v42 = vpop.f32.mrb[2].mxu0  ;;  %v359_v39 = vld [vmem:[%s2794_s5 + $0xc8] sm:$0xff]  ;;  %1606 = vmatprep.subr.bf16.mxu0 %v1605_v35  ;;  %v1761_v35 = vmov 1.0  }
  0xe4   :  { %v124_v43 = vpop.f32.mrb[3].mxu0  ;;  %1754 = vtanh.f32 %v120_v41  ;;  %v130_v46 = vadd.f32 %v1568_v42, %v34_v45  ;;  %v1609_v41 = vpack.c.bf16 %v359_v39, %v358_v38  ;;  %v342_v42 = vld [vmem:[%s2794_s5 + $0x40] sm:$0xff]  ;;  %v361_v45 = vld [vmem:[%s2794_s5 + $0xd8] sm:$0xff]  ;;  %v1269_v39 = vld [vmem:[%s2790_s3 + $0xe8] sm:$0xff] }
  0xe5   :  { %v125_v44 = vadd.f32 %v124_v43, %v33_v40  ;;  %v1607_v40 = vpack.c.bf16 %v341_v37, %v340_v36  ;;  %v343_v43 = vld [vmem:[%s2794_s5 + $0x48] sm:$0xff] }
  0xe7   :  { %1756 = vtanh.f32 %v125_v44  ;;  %v360_v44 = vld [vmem:[%s2794_s5 + $0xd0] sm:$0xff]  ;;  %1608 = vmatpush3.bf16.msra.mxu0 %v1607_v40  ;;  %v1271_v40 = vld [vmem:[%s2790_s3 + $0xf8] sm:$0xff] }
  0xe8   :  { %1758 = vtanh.f32 %v130_v46  ;;  %v1611_v46 = vpack.c.bf16 %v343_v43, %v342_v42  ;;  %1610 = vmatprep.subr.bf16.mxu0 %v1609_v41  ;;  %v1613_v52 = vpack.c.bf16 %v361_v45, %v360_v44  ;;  %v1637_v41 = vpack.c.bf16 %v1271_v40, %v1269_v39  ;;  %v1268_v42 = vld [vmem:[%s2790_s3 + $0xe0] sm:$0xff]  ;;  %v1270_v43 = vld [vmem:[%s2790_s3 + $0xf0] sm:$0xff] }
  0xe9   :  { %v1639_v44 = vpack.c.bf16 %v1270_v43, %v1268_v42  ;;  %v1290_v42 = vld [vmem:[%s2794_s5 + $0x128] sm:$0xff]  ;;  %v1307_v43 = vld [vmem:[%s2794_s5 + $0x1b0] sm:$0xff] }
  0xeb   :  { %1612 = vmatpush3.bf16.msra.mxu0 %v1611_v46 }
  0xec   :  { %1614 = vmatprep.subr.bf16.mxu0 %v1613_v52 }
  0xed   :  { %v1886_v47 = vpop.eup %1752 }
  0xee   :  { %1236 = vmatmul.mubr.msk.f32.vlgmr.msra.gmra.mrb[0].mxu1 %vm168_vm1, %v1886_v47  ;;  %v1891_v48 = vpop.eup %1754 }
  0xef   :  { %251 = vmatprep.mubr.f32.mxu1 %v1760_v33 }
  0xf1   :  { %v1895_v49 = vpop.eup %1756 }
  0xf2   :  { %1237 = vmatmul.mubr.msk.f32.gmra.mrb[2].mxu1 %vm168_vm1, %v1891_v48  ;;  %v1900_v50 = vpop.eup %1758 }
  0xf3   :  { %257 = vmatprep.mubr.f32.mxu1 %v1760_v33 }
  0xf6   :  { %1238 = vmatmul.mubr.msk.f32.gmra.mrb[4].mxu1 %vm168_vm1, %v1895_v49 }
  0xf7   :  { %263 = vmatprep.mubr.f32.mxu1 %v1760_v33 }
  0xfa   :  { %1239 = vmatmul.mubr.msk.f32.gmra.mrb[6].mxu1 %vm168_vm1, %v1900_v50 }
  0xfb   :  { %561 = vmatprep.mubr.f32.mxu1 %v1760_v33 }
 0x1c1   :  { %v247_v58 = vpop.f32.mrb[0].mxu1 }
 0x1c2   :  { %v1916_v59 = vadd.f32 %v247_v58, %v161_v56  ;;  %v249_v60 = vpop.f32.mrb[1].mxu1  ;;  %v363_v58 = vld [vmem:[%s2794_s5 + $0xe8] sm:$0xff] }
 0x1c3   :  { %v1918_v61 = vadd.f32 %v249_v60, %v165_v57 }
 0x1c4   :  { %270 = vst [vmem:[%s2793_s6] sm:$0xff] %v1916_v59 }
 0x1c5   :  { %271 = vst [vmem:[%s2793_s6 + $0x8] sm:$0xff] %v1918_v61  ;;  %v253_v62 = vpop.f32.mrb[2].mxu1  ;;  %vm278_vm2 = vcmp.ge.f32.partialorder %v1916_v59, %v1918_v61 }
 0x1c6   :  { %v1930_v63 = vadd.f32 %v253_v62, %v161_v56  ;;  %v255_v0 = vpop.f32.mrb[3].mxu1  ;;  %v279_v1 = vsel %vm278_vm2, %v1916_v59, %v1918_v61  ;;  %v280_v18 = vsel %vm278_vm2, %v2089_v14, %v2092_v16 }
 0x1c7   :  { %v1937_v2 = vadd.f32 %v255_v0, %v165_v57  ;;  %281 = vmax.index.xlane.f32.xlu0 %v279_v1  ;;  %v346_v0 = vld [vmem:[%s2794_s5 + $0x60] sm:$0xff]  ;;  %v347_v1 = vld [vmem:[%s2794_s5 + $0x68] sm:$0xff] }
 0x1c8   :  { %272 = vst [vmem:[%s2793_s6 + $0x40] sm:$0xff] %v1930_v63 }
 0x1c9   :  { %273 = vst [vmem:[%s2793_s6 + $0x48] sm:$0xff] %v1937_v2  ;;  %v259_v3 = vpop.f32.mrb[4].mxu1  ;;  %vm286_vm3 = vcmp.ge.f32.partialorder %v1930_v63, %v1937_v2 }
 0x1ca   :  { %v1949_v4 = vadd.f32 %v259_v3, %v161_v56  ;;  %v261_v5 = vpop.f32.mrb[5].mxu1  ;;  %v287_v6 = vsel %vm286_vm3, %v1930_v63, %v1937_v2  ;;  %v364_v3 = vld [vmem:[%s2794_s5 + $0xf0] sm:$0xff]  ;;  %v288_v51 = vsel %vm286_vm3, %v2089_v14, %v2092_v16  ;;  %v1257_v63 = vld [vmem:[%s2790_s3 + $0x88] sm:$0xff]  ;;  %v1259_v2 = vld [vmem:[%s2790_s3 + $0x98] sm:$0xff] }
 0x1cb   :  { %v1956_v7 = vadd.f32 %v261_v5, %v165_v57  ;;  %289 = vmax.index.xlane.f32.xlu0 %v287_v6  ;;  %v365_v5 = vld [vmem:[%s2794_s5 + $0xf8] sm:$0xff]  ;;  %v1619_v6 = vpack.c.bf16 %v347_v1, %v346_v0 }
 0x1cc   :  { %274 = vst [vmem:[%s2793_s6 + $0x80] sm:$0xff] %v1949_v4 }
 0x1cd   :  { %275 = vst [vmem:[%s2793_s6 + $0x88] sm:$0xff] %v1956_v7  ;;  %v265_v8 = vpop.f32.mrb[6].mxu1  ;;  %vm294_vm4 = vcmp.ge.f32.partialorder %v1949_v4, %v1956_v7 }
 0x1ce   :  { %v1968_v9 = vadd.f32 %v265_v8, %v161_v56  ;;  %v267_v10 = vpop.f32.mrb[7].mxu1  ;;  %v295_v11 = vsel %vm294_vm4, %v1949_v4, %v1956_v7  ;;  %v345_v56 = vld [vmem:[%s2794_s5 + $0x58] sm:$0xff]  ;;  %v1621_v8 = vpack.c.bf16 %v365_v5, %v364_v3  ;;  %v296_v20 = vsel %vm294_vm4, %v2089_v14, %v2092_v16  ;;  %v1256_v4 = vld [vmem:[%s2790_s3 + $0x80] sm:$0xff] }
 0x1cf   :  { %v1975_v12 = vadd.f32 %v267_v10, %v165_v57  ;;  %297 = vmax.index.xlane.f32.xlu1 %v295_v11  ;;  %v362_v57 = vld [vmem:[%s2794_s5 + $0xe0] sm:$0xff]  ;;  %v1615_v60 = vpack.c.bf16 %v345_v56, %v344_v54  ;;  %v348_v10 = vld [vmem:[%s2794_s5 + $0x70] sm:$0xff]  ;;  %v349_v11 = vld [vmem:[%s2794_s5 + $0x78] sm:$0xff]  ;;  %v1625_v7 = vpack.c.bf16 %v1259_v2, %v1257_v63  ;;  %v1627_v22 = vpack.c.bf16 %v1258_v21, %v1256_v4 }
 0x1d0   :  { %276 = vst [vmem:[%s2793_s6 + $0xc0] sm:$0xff] %v1968_v9  ;;  %v1617_v62 = vpack.c.bf16 %v363_v58, %v362_v57 }
 0x1d1   :  { %277 = vst [vmem:[%s2793_s6 + $0xc8] sm:$0xff] %v1975_v12  ;;  %vm302_vm5 = vcmp.ge.f32.partialorder %v1968_v9, %v1975_v12  ;;  %1616 = vmatpush3.bf16.msra.mxu0 %v1615_v60  ;;  %1626 = vmatprep.subr.bf16.mxu1 %v1625_v7 }
 0x1d2   :  { %v303_v13 = vsel %vm302_vm5, %v1968_v9, %v1975_v12  ;;  %1618 = vmatprep.subr.bf16.mxu0 %v1617_v62  ;;  %v304_v61 = vsel %vm302_vm5, %v2089_v14, %v2092_v16  ;;  %v1261_v9 = vld [vmem:[%s2790_s3 + $0xa8] sm:$0xff]  ;;  %v1263_v12 = vld [vmem:[%s2790_s3 + $0xb8] sm:$0xff]  ;;  %1628 = vmatpush1.bf16.msra.mxu1 %v1627_v22 }
 0x1d3   :  { %305 = vmax.index.xlane.f32.xlu1 %v303_v13  ;;  %v1623_v13 = vpack.c.bf16 %v349_v11, %v348_v10  ;;  %v1629_v23 = vpack.c.bf16 %v1263_v12, %v1261_v9 }
 0x1d5   :  { %1620 = vmatpush3.bf16.msra.mxu0 %v1619_v6  ;;  %1630 = vmatprep.subr.bf16.mxu1 %v1629_v23 }
 0x1d6   :  { %1622 = vmatprep.subr.bf16.mxu0 %v1621_v8  ;;  %1632 = vmatpush1.bf16.msra.mxu1 %v1631_v28  ;;  %v1272_v8 = vld [vmem:[%s2792_s4 + $0x2] sm:$0x3]  ;;  %v1286_v28 = vld [vmem:[%s2794_s5 + $0x108] sm:$0xff] }
 0x1d7   :  { %1634 = vmatprep.subr.bf16.mxu1 %v1633_v29  ;;  %v482_v10 = vrot.slane %v1272_v8, %v1912_v55  ;;  %v1303_v29 = vld [vmem:[%s2794_s5 + $0x190] sm:$0xff]  ;;  %v1643_v31 = vpack.c.bf16 %v1286_v28, %v1285_v26 }
 0x1d9   :  { %1624 = vmatpush3.bf16.msra.mxu0 %v1623_v13 }
 0x1da   :  { %1636 = vmatpush1.bf16.msra.mxu1 %v1635_v32  ;;  %v1645_v32 = vpack.c.bf16 %v1304_v30, %v1303_v29 }
 0x1db   :  { %1638 = vmatprep.subr.bf16.mxu1 %v1637_v41  ;;  %v1289_v41 = vld [vmem:[%s2794_s5 + $0x120] sm:$0xff] }
 0x1de   :  { %1640 = vmatpush1.bf16.msra.mxu1 %v1639_v44  ;;  %v1308_v44 = vld [vmem:[%s2794_s5 + $0x1b8] sm:$0xff] }
 0x1df   :  { %1642 = vmatprep.subr.bf16.mxu1 %v1641_v27 }
 0x254   :  { %v282_v15 = vpop.xlane.xlu0 %281 }
 0x255   :  { %1739 = vset.pattern.permute.xlu0 %v282_v15 }
 0x258   :  { %v290_v17 = vpop.xlane.xlu0 %289 }
 0x259   :  { %284 = vperm.xlu0 %1739, %v280_v18   ;;  %1740 = vset.pattern.permute.xlu1 %v290_v17 }
 0x25c   :  { %v298_v19 = vpop.xlane.xlu1 %297 }
 0x25d   :  { %292 = vperm.xlu1 %1740, %v288_v51  }
 0x260   :  { %v306_v59 = vpop.xlane.xlu1 %305 }
 0x261   :  { %1741 = vset.pattern.permute.xlu1 %v298_v19 }
 0x265   :  { %300 = vperm.xlu1 %1741, %v296_v20  }
 0x269   :  { %1742 = vset.pattern.permute.xlu1 %v306_v59 }
 0x26d   :  { %308 = vperm.xlu1 %1742, %v304_v61  }
 0x2d8   :  { %v285_v34 = vpop.permute.xlu0 %284 }
 0x2d9   :  { %vm310_vm6 = vcmp.eq.s32.totalorder %v2089_v14, %v285_v34  ;;  %vm311_vm7 = vcmp.eq.s32.totalorder %v2092_v16, %v285_v34  ;;  %v1287_v34 = vld [vmem:[%s2794_s5 + $0x110] sm:$0xff] }
 0x2da   :  { %1248 = vmatprep.mubr.msk.f32.mxu0 %vm311_vm7, %v1761_v35 }
 0x2db   :  { %1249 = vmatmul.mubr.msk.f32.vlgmr.msra.gmra.mrb[4].mxu0 %vm310_vm6, %v1761_v35 }
 0x2dc   :  { %v293_v36 = vpop.permute.xlu1 %292 }
 0x2dd   :  { %vm312_vm8 = vcmp.eq.s32.totalorder %v2089_v14, %v293_v36  ;;  %vm313_vm9 = vcmp.eq.s32.totalorder %v2092_v16, %v293_v36  ;;  %v1288_v36 = vld [vmem:[%s2794_s5 + $0x118] sm:$0xff] }
 0x2de   :  { %1250 = vmatprep.mubr.msk.f32.mxu0 %vm313_vm9, %v1761_v35  ;;  %v1647_v39 = vpack.c.bf16 %v1288_v36, %v1287_v34 }
 0x2df   :  { %1251 = vmatmul.mubr.msk.f32.gmra.mrb[6].mxu0 %vm312_vm8, %v1761_v35 }
 0x2e4   :  { %v301_v37 = vpop.permute.xlu1 %300 }
 0x2e5   :  { %vm314_vm10 = vcmp.eq.s32.totalorder %v2089_v14, %v301_v37  ;;  %vm315_vm11 = vcmp.eq.s32.totalorder %v2092_v16, %v301_v37  ;;  %v1305_v37 = vld [vmem:[%s2794_s5 + $0x1a0] sm:$0xff] }
 0x2e6   :  { %1252 = vmatprep.mubr.msk.f32.mxu0 %vm315_vm11, %v1761_v35 }
 0x2e7   :  { %1253 = vmatmul.mubr.msk.f32.gmra.mrb[8].mxu0 %vm314_vm10, %v1761_v35 }
 0x2ec   :  { %v309_v38 = vpop.permute.xlu1 %308 }
 0x2ed   :  { %vm316_vm12 = vcmp.eq.s32.totalorder %v2089_v14, %v309_v38  ;;  %vm317_vm13 = vcmp.eq.s32.totalorder %v2092_v16, %v309_v38  ;;  %v1306_v38 = vld [vmem:[%s2794_s5 + $0x1a8] sm:$0xff] }
 0x2ee   :  { %1254 = vmatprep.mubr.msk.f32.mxu0 %vm317_vm13, %v1761_v35  ;;  %v1649_v40 = vpack.c.bf16 %v1306_v38, %v1305_v37  ;;  %v1329_v37 = vld [vmem:[%s2790_s3 + $0x120] sm:$0xff]  ;;  %v1331_v38 = vld [vmem:[%s2790_s3 + $0x130] sm:$0xff] }
 0x2ef   :  { %1255 = vmatmul.mubr.msk.f32.gmra.mrb[10].mxu0 %vm316_vm12, %v1761_v35 }
 0x2f0   :  { %878 = vmatprep.mubr.f32.mxu0 %v1760_v33 }
 0x3ae   :  { %v1455_v45 = vpop.f32.mrb[4].mxu0 }
 0x3af   :  { %v1456_v46 = vpop.f32.mrb[5].mxu0 }
 0x3b0   :  { %v1457_v52 = vadd.f32 %v1456_v46, %v1455_v45  ;;  %v1651_v45 = vpack.c.bf16 %v1290_v42, %v1289_v41  ;;  %v1653_v46 = vpack.c.bf16 %v1308_v44, %v1307_v43  ;;  %v1679_v41 = vpack.c.bf16 %v1331_v38, %v1329_v37  ;;  %v1333_v43 = vld [vmem:[%s2790_s3 + $0x140] sm:$0xff]  ;;  %v1335_v44 = vld [vmem:[%s2790_s3 + $0x150] sm:$0xff]  ;;  %v1371_v38 = vld [vmem:[%s2794_s5 + $0x288] sm:$0xff] }
 0x3b1   :  { %v1370_v37 = vld [vmem:[%s2794_s5 + $0x280] sm:$0xff] }
 0x3b2   :  { %v2180_v54 = vadd.f32 %v1886_v47, %v1457_v52  ;;  %v1458_v56 = vpop.f32.mrb[6].mxu0  ;;  %v1291_v52 = vld [vmem:[%s2794_s5 + $0x130] sm:$0xff] }
 0x3b3   :  { %v1459_v57 = vpop.f32.mrb[7].mxu0 }
 0x3b4   :  { %v1460_v58 = vadd.f32 %v1459_v57, %v1458_v56  ;;  %1273 = vmatmul.mubr.msk.f32.vlgmr.msra.gmra.mrb[8].mxu1 %vm168_vm1, %v2180_v54  ;;  %v1292_v56 = vld [vmem:[%s2794_s5 + $0x138] sm:$0xff]  ;;  %v1309_v57 = vld [vmem:[%s2794_s5 + $0x1c0] sm:$0xff] }
 0x3b5   :  { %567 = vmatprep.mubr.f32.mxu1 %v1760_v33  ;;  %1644 = vmatpush3.bf16.msra.mxu1 %v1643_v31 }
 0x3b6   :  { %v2186_v60 = vadd.f32 %v1891_v48, %v1460_v58  ;;  %1646 = vmatprep.subr.bf16.mxu1 %v1645_v32  ;;  %v1310_v58 = vld [vmem:[%s2794_s5 + $0x1c8] sm:$0xff]  ;;  %v1327_v32 = vld [vmem:[%s2790_s3 + $0x110] sm:$0xff] }
 0x3b8   :  { %1274 = vmatmul.mubr.msk.f32.gmra.mrb[10].mxu1 %vm168_vm1, %v2186_v60 }
 0x3b9   :  { %573 = vmatprep.mubr.f32.mxu1 %v1760_v33  ;;  %1648 = vmatpush3.bf16.msra.mxu1 %v1647_v39  ;;  %v1334_v39 = vld [vmem:[%s2790_s3 + $0x148] sm:$0xff] }
 0x3ba   :  { %v1461_v62 = vpop.f32.mrb[8].mxu0  ;;  %1650 = vmatprep.subr.bf16.mxu1 %v1649_v40  ;;  %v1336_v40 = vld [vmem:[%s2790_s3 + $0x158] sm:$0xff] }
 0x3bb   :  { %v1462_v0 = vpop.f32.mrb[9].mxu0  ;;  %v1681_v42 = vpack.c.bf16 %v1336_v40, %v1334_v39  ;;  %v1354_v39 = vld [vmem:[%s2794_s5 + $0x200] sm:$0xff]  ;;  %v1689_v40 = vpack.c.bf16 %v1371_v38, %v1370_v37  ;;  %v1369_v37 = vld [vmem:[%s2794_s5 + $0x278] sm:$0xff] }
 0x3bc   :  { %v1463_v47 = vadd.f32 %v1462_v0, %v1461_v62  ;;  %v1655_v62 = vpack.c.bf16 %v1292_v56, %v1291_v52  ;;  %v1657_v0 = vpack.c.bf16 %v1310_v58, %v1309_v57  ;;  %v1338_v58 = vld [vmem:[%s2790_s3 + $0x168] sm:$0xff] }
 0x3bd   :  { %1652 = vmatpush3.bf16.msra.mxu1 %v1651_v45  ;;  %v1683_v45 = vpack.c.bf16 %v1335_v44, %v1333_v43  ;;  %v1373_v43 = vld [vmem:[%s2794_s5 + $0x298] sm:$0xff] }
 0x3be   :  { %v2192_v1 = vadd.f32 %v1895_v49, %v1463_v47  ;;  %v478_v49 = vrot.slane %v1272_v8, %v1907_v53  ;;  %1654 = vmatprep.subr.bf16.mxu1 %v1653_v46  ;;  %v1293_v47 = vld [vmem:[%s2794_s5 + $0x140] sm:$0xff] }
 0x3c0   :  { %1275 = vmatmul.mubr.msk.f32.gmra.mrb[12].mxu1 %vm168_vm1, %v2192_v1 }
 0x3c1   :  { %579 = vmatprep.mubr.f32.mxu1 %v1760_v33  ;;  %1656 = vmatpush3.bf16.msra.mxu1 %v1655_v62  ;;  %v1340_v62 = vld [vmem:[%s2790_s3 + $0x178] sm:$0xff] }
 0x3c2   :  { %v1464_v3 = vpop.f32.mrb[10].mxu0  ;;  %1658 = vmatprep.subr.bf16.mxu1 %v1657_v0  ;;  %v1685_v0 = vpack.c.bf16 %v1340_v62, %v1338_v58 }
 0x3c3   :  { %v1465_v5 = vpop.f32.mrb[11].mxu0 }
 0x3c4   :  { %v1466_v48 = vadd.f32 %v1465_v5, %v1464_v3  ;;  %v1294_v3 = vld [vmem:[%s2794_s5 + $0x148] sm:$0xff]  ;;  %v1311_v5 = vld [vmem:[%s2794_s5 + $0x1d0] sm:$0xff] }
 0x3c5   :  { %v1659_v8 = vpack.c.bf16 %v1294_v3, %v1293_v47  ;;  %v1337_v47 = vld [vmem:[%s2790_s3 + $0x160] sm:$0xff]  ;;  %v1339_v3 = vld [vmem:[%s2790_s3 + $0x170] sm:$0xff] }
 0x3c6   :  { %v2198_v6 = vadd.f32 %v1900_v50, %v1466_v48  ;;  %v1312_v48 = vld [vmem:[%s2794_s5 + $0x1d8] sm:$0xff] }
 0x3c7   :  { %1660 = vmatpush3.bf16.msra.mxu1 %v1659_v8 }
 0x3c8   :  { %1276 = vmatmul.mubr.msk.f32.gmra.mrb[14].mxu1 %vm168_vm1, %v2198_v6 }
 0x487   :  { %v563_v11 = vpop.f32.mrb[8].mxu1 }
 0x488   :  { %v2207_v13 = vadd.f32 %v563_v11, %v478_v49  ;;  %v565_v15 = vpop.f32.mrb[9].mxu1  ;;  %v1296_v11 = vld [vmem:[%s2794_s5 + $0x158] sm:$0xff] }
 0x489   :  { %v2209_v17 = vadd.f32 %v565_v15, %v482_v10  ;;  %v1313_v15 = vld [vmem:[%s2794_s5 + $0x1e0] sm:$0xff] }
 0x48a   :  { %586 = vst [vmem:[%s2793_s6 + $0x10] sm:$0xff] %v2207_v13 }
 0x48b   :  { %587 = vst [vmem:[%s2793_s6 + $0x18] sm:$0xff] %v2209_v17  ;;  %v569_v50 = vpop.f32.mrb[10].mxu1  ;;  %vm594_vm14 = vcmp.ge.f32.partialorder %v2207_v13, %v2209_v17 }
 0x48c   :  { %v2221_v18 = vadd.f32 %v569_v50, %v478_v49  ;;  %v571_v51 = vpop.f32.mrb[11].mxu1  ;;  %v595_v19 = vsel %vm594_vm14, %v2207_v13, %v2209_v17  ;;  %v1314_v50 = vld [vmem:[%s2794_s5 + $0x1e8] sm:$0xff]  ;;  %v596_v28 = vsel %vm594_vm14, %v2089_v14, %v2092_v16 }
 0x48d   :  { %v2228_v20 = vadd.f32 %v571_v51, %v482_v10  ;;  %597 = vmax.index.xlane.f32.xlu1 %v595_v19  ;;  %v1665_v19 = vpack.c.bf16 %v1314_v50, %v1313_v15 }
 0x48e   :  { %588 = vst [vmem:[%s2793_s6 + $0x50] sm:$0xff] %v2221_v18 }
 0x48f   :  { %589 = vst [vmem:[%s2793_s6 + $0x58] sm:$0xff] %v2228_v20  ;;  %vm602_vm15 = vcmp.ge.f32.partialorder %v2221_v18, %v2228_v20 }
 0x490   :  { %v603_v59 = vsel %vm602_vm15, %v2221_v18, %v2228_v20  ;;  %v604_v29 = vsel %vm602_vm15, %v2089_v14, %v2092_v16  ;;  %v1326_v18 = vld [vmem:[%s2790_s3 + $0x108] sm:$0xff]  ;;  %v1328_v20 = vld [vmem:[%s2790_s3 + $0x118] sm:$0xff] }
 0x491   :  { %605 = vmax.index.xlane.f32.xlu0 %v603_v59  ;;  %v1297_v59 = vld [vmem:[%s2794_s5 + $0x160] sm:$0xff] }
 0x493   :  { %v575_v61 = vpop.f32.mrb[12].mxu1 }
 0x494   :  { %v2245_v63 = vadd.f32 %v575_v61, %v478_v49  ;;  %v577_v2 = vpop.f32.mrb[13].mxu1  ;;  %v1298_v61 = vld [vmem:[%s2794_s5 + $0x168] sm:$0xff] }
 0x495   :  { %v2247_v4 = vadd.f32 %v577_v2, %v482_v10  ;;  %v1315_v2 = vld [vmem:[%s2794_s5 + $0x1f0] sm:$0xff] }
 0x496   :  { %590 = vst [vmem:[%s2793_s6 + $0x90] sm:$0xff] %v2245_v63 }
 0x497   :  { %591 = vst [vmem:[%s2793_s6 + $0x98] sm:$0xff] %v2247_v4  ;;  %vm610_vm0 = vcmp.ge.f32.partialorder %v2245_v63, %v2247_v4 }
 0x498   :  { %v611_v7 = vsel %vm610_vm0, %v2245_v63, %v2247_v4  ;;  %v612_v31 = vsel %vm610_vm0, %v2089_v14, %v2092_v16  ;;  %v1325_v63 = vld [vmem:[%s2790_s3 + $0x100] sm:$0xff]  ;;  %v1673_v4 = vpack.c.bf16 %v1328_v20, %v1326_v18 }
 0x499   :  { %613 = vmax.index.xlane.f32.xlu1 %v611_v7  ;;  %v1316_v7 = vld [vmem:[%s2794_s5 + $0x1f8] sm:$0xff]  ;;  %v1675_v34 = vpack.c.bf16 %v1327_v32, %v1325_v63 }
 0x49a   :  { %1674 = vmatprep.subr.bf16.mxu0 %v1673_v4 }
 0x49b   :  { %v581_v21 = vpop.f32.mrb[14].mxu1  ;;  %1676 = vmatpush1.bf16.msra.mxu0 %v1675_v34 }
 0x49c   :  { %v2264_v9 = vadd.f32 %v581_v21, %v478_v49  ;;  %v583_v12 = vpop.f32.mrb[15].mxu1  ;;  %v1661_v49 = vpack.c.bf16 %v1312_v48, %v1311_v5  ;;  %v1667_v21 = vpack.c.bf16 %v1298_v61, %v1297_v59  ;;  %v1687_v5 = vpack.c.bf16 %v1339_v3, %v1337_v47  ;;  %v1359_v47 = vld [vmem:[%s2794_s5 + $0x228] sm:$0xff]  ;;  %v1376_v3 = vld [vmem:[%s2794_s5 + $0x2b0] sm:$0xff] }
 0x49d   :  { %v2266_v22 = vadd.f32 %v583_v12, %v482_v10  ;;  %v1295_v10 = vld [vmem:[%s2794_s5 + $0x150] sm:$0xff]  ;;  %v1669_v12 = vpack.c.bf16 %v1316_v7, %v1315_v2 }
 0x49e   :  { %592 = vst [vmem:[%s2793_s6 + $0xd0] sm:$0xff] %v2264_v9  ;;  %v1663_v51 = vpack.c.bf16 %v1296_v11, %v1295_v10  ;;  %1662 = vmatprep.subr.bf16.mxu1 %v1661_v49 }
 0x49f   :  { %593 = vst [vmem:[%s2793_s6 + $0xd8] sm:$0xff] %v2266_v22  ;;  %vm618_vm2 = vcmp.ge.f32.partialorder %v2264_v9, %v2266_v22 }
 0x4a0   :  { %v619_v23 = vsel %vm618_vm2, %v2264_v9, %v2266_v22  ;;  %1664 = vmatpush3.bf16.msra.mxu1 %v1663_v51  ;;  %v620_v17 = vsel %vm618_vm2, %v2089_v14, %v2092_v16  ;;  %v1330_v9 = vld [vmem:[%s2790_s3 + $0x128] sm:$0xff]  ;;  %v1332_v22 = vld [vmem:[%s2790_s3 + $0x138] sm:$0xff] }
 0x4a1   :  { %621 = vmax.index.xlane.f32.xlu1 %v619_v23  ;;  %1666 = vmatprep.subr.bf16.mxu1 %v1665_v19  ;;  %v1299_v23 = vld [vmem:[%s2794_s5 + $0x170] sm:$0xff]  ;;  %v1677_v36 = vpack.c.bf16 %v1332_v22, %v1330_v9 }
 0x4a2   :  { %v1671_v25 = vpack.c.bf16 %v1300_v24, %v1299_v23 }
 0x4a3   :  { %1678 = vmatprep.subr.bf16.mxu0 %v1677_v36 }
 0x4a4   :  { %1668 = vmatpush3.bf16.msra.mxu1 %v1667_v21  ;;  %1680 = vmatpush1.bf16.msra.mxu0 %v1679_v41  ;;  %v1355_v41 = vld [vmem:[%s2794_s5 + $0x208] sm:$0xff] }
 0x4a5   :  { %1670 = vmatprep.subr.bf16.mxu1 %v1669_v12  ;;  %1682 = vmatprep.subr.bf16.mxu0 %v1681_v42  ;;  %v1341_v12 = vld [vmem:[%s2792_s4 + $0x4] sm:$0x3]  ;;  %v1372_v42 = vld [vmem:[%s2794_s5 + $0x290] sm:$0xff]  ;;  %v1691_v44 = vpack.c.bf16 %v1355_v41, %v1354_v39 }
 0x4a6   :  { %v799_v23 = vrot.slane %v1341_v12, %v1912_v55 }
 0x4a8   :  { %1672 = vmatpush3.bf16.msra.mxu1 %v1671_v25  ;;  %1684 = vmatpush1.bf16.msra.mxu0 %v1683_v45  ;;  %v1693_v45 = vpack.c.bf16 %v1373_v43, %v1372_v42 }
 0x4a9   :  { %1686 = vmatprep.subr.bf16.mxu0 %v1685_v0  ;;  %v1358_v0 = vld [vmem:[%s2794_s5 + $0x220] sm:$0xff] }
 0x4ac   :  { %1688 = vmatpush1.bf16.msra.mxu0 %v1687_v5  ;;  %v1377_v5 = vld [vmem:[%s2794_s5 + $0x2b8] sm:$0xff] }
 0x4ad   :  { %1690 = vmatprep.subr.bf16.mxu0 %v1689_v40 }
 0x51a   :  { %v598_v26 = vpop.xlane.xlu1 %597 }
 0x51b   :  { %1743 = vset.pattern.permute.xlu1 %v598_v26 }
 0x51e   :  { %v606_v27 = vpop.xlane.xlu0 %605 }
 0x51f   :  { %1744 = vset.pattern.permute.xlu0 %v606_v27  ;;  %600 = vperm.xlu1 %1743, %v596_v28  }
 0x523   :  { %608 = vperm.xlu0 %1744, %v604_v29  }
 0x526   :  { %v614_v30 = vpop.xlane.xlu1 %613 }
 0x527   :  { %1745 = vset.pattern.permute.xlu1 %v614_v30 }
 0x52b   :  { %616 = vperm.xlu1 %1745, %v612_v31  }
 0x52e   :  { %v622_v13 = vpop.xlane.xlu1 %621 }
 0x52f   :  { %1746 = vset.pattern.permute.xlu1 %v622_v13 }
 0x533   :  { %624 = vperm.xlu1 %1746, %v620_v17  }
 0x59e   :  { %v601_v46 = vpop.permute.xlu1 %600 }
 0x59f   :  { %vm626_vm3 = vcmp.eq.s32.totalorder %v2089_v14, %v601_v46  ;;  %vm627_vm4 = vcmp.eq.s32.totalorder %v2092_v16, %v601_v46  ;;  %v1356_v46 = vld [vmem:[%s2794_s5 + $0x210] sm:$0xff] }
 0x5a0   :  { %1317 = vmatprep.mubr.msk.f32.mxu1 %vm627_vm4, %v1761_v35 }
 0x5a1   :  { %1318 = vmatmul.mubr.msk.f32.vlgmr.msra.gmra.mrb[16].mxu1 %vm626_vm3, %v1761_v35 }
 0x5a2   :  { %v609_v52 = vpop.permute.xlu0 %608 }
 0x5a3   :  { %vm628_vm5 = vcmp.eq.s32.totalorder %v2089_v14, %v609_v52  ;;  %vm629_vm6 = vcmp.eq.s32.totalorder %v2092_v16, %v609_v52  ;;  %v1357_v52 = vld [vmem:[%s2794_s5 + $0x218] sm:$0xff] }
 0x5a4   :  { %1319 = vmatprep.mubr.msk.f32.mxu1 %vm629_vm6, %v1761_v35  ;;  %v1695_v58 = vpack.c.bf16 %v1357_v52, %v1356_v46 }
 0x5a5   :  { %1320 = vmatmul.mubr.msk.f32.gmra.mrb[18].mxu1 %vm628_vm5, %v1761_v35 }
 0x5aa   :  { %v617_v56 = vpop.permute.xlu1 %616 }
 0x5ab   :  { %vm630_vm7 = vcmp.eq.s32.totalorder %v2089_v14, %v617_v56  ;;  %vm631_vm8 = vcmp.eq.s32.totalorder %v2092_v16, %v617_v56  ;;  %v1374_v56 = vld [vmem:[%s2794_s5 + $0x2a0] sm:$0xff] }
 0x5ac   :  { %1321 = vmatprep.mubr.msk.f32.mxu1 %vm631_vm8, %v1761_v35 }
 0x5ad   :  { %1322 = vmatmul.mubr.msk.f32.gmra.mrb[20].mxu1 %vm630_vm7, %v1761_v35 }
 0x5b2   :  { %v625_v57 = vpop.permute.xlu1 %624 }
 0x5b3   :  { %vm632_vm9 = vcmp.eq.s32.totalorder %v2089_v14, %v625_v57  ;;  %vm633_vm10 = vcmp.eq.s32.totalorder %v2092_v16, %v625_v57  ;;  %v1375_v57 = vld [vmem:[%s2794_s5 + $0x2a8] sm:$0xff] }
 0x5b4   :  { %1323 = vmatprep.mubr.msk.f32.mxu1 %vm633_vm10, %v1761_v35  ;;  %v1697_v62 = vpack.c.bf16 %v1375_v57, %v1374_v56  ;;  %v1398_v56 = vld [vmem:[%s2790_s3 + $0x1a0] sm:$0xff]  ;;  %v1400_v57 = vld [vmem:[%s2790_s3 + $0x1b0] sm:$0xff] }
 0x5b5   :  { %1324 = vmatmul.mubr.msk.f32.gmra.mrb[22].mxu1 %vm632_vm9, %v1761_v35 }
 0x5b6   :  { %1195 = vmatprep.mubr.f32.mxu1 %v1760_v33 }
 0x674   :  { %v1499_v48 = vpop.f32.mrb[16].mxu1 }
 0x675   :  { %v1500_v8 = vpop.f32.mrb[17].mxu1 }
 0x676   :  { %v1501_v49 = vadd.f32 %v1500_v8, %v1499_v48  ;;  %v1699_v48 = vpack.c.bf16 %v1359_v47, %v1358_v0  ;;  %v1701_v8 = vpack.c.bf16 %v1377_v5, %v1376_v3  ;;  %v1727_v0 = vpack.c.bf16 %v1400_v57, %v1398_v56  ;;  %v1402_v3 = vld [vmem:[%s2790_s3 + $0x1c0] sm:$0xff]  ;;  %v1404_v5 = vld [vmem:[%s2790_s3 + $0x1d0] sm:$0xff] }
 0x678   :  { %v2465_v10 = vadd.f32 %v1501_v49, %v2180_v54  ;;  %v1502_v11 = vpop.f32.mrb[18].mxu1  ;;  %v1360_v49 = vld [vmem:[%s2794_s5 + $0x230] sm:$0xff] }
 0x679   :  { %v1503_v15 = vpop.f32.mrb[19].mxu1 }
 0x67a   :  { %v1504_v50 = vadd.f32 %v1503_v15, %v1502_v11  ;;  %1342 = vmatmul.mubr.msk.f32.vlgmr.msra.gmra.mrb[12].mxu0 %vm168_vm1, %v2465_v10  ;;  %v1361_v11 = vld [vmem:[%s2794_s5 + $0x238] sm:$0xff]  ;;  %v1378_v15 = vld [vmem:[%s2794_s5 + $0x2c0] sm:$0xff] }
 0x67b   :  { %884 = vmatprep.mubr.f32.mxu0 %v1760_v33  ;;  %1692 = vmatpush3.bf16.msra.mxu0 %v1691_v44 }
 0x67c   :  { %v2471_v51 = vadd.f32 %v1504_v50, %v2186_v60  ;;  %1694 = vmatprep.subr.bf16.mxu0 %v1693_v45  ;;  %v1379_v50 = vld [vmem:[%s2794_s5 + $0x2c8] sm:$0xff]  ;;  %v1396_v45 = vld [vmem:[%s2790_s3 + $0x190] sm:$0xff] }
 0x67e   :  { %1343 = vmatmul.mubr.msk.f32.gmra.mrb[14].mxu0 %vm168_vm1, %v2471_v51 }
 0x67f   :  { %890 = vmatprep.mubr.f32.mxu0 %v1760_v33  ;;  %1696 = vmatpush3.bf16.msra.mxu0 %v1695_v58  ;;  %v1403_v58 = vld [vmem:[%s2790_s3 + $0x1c8] sm:$0xff] }
 0x680   :  { %v1505_v19 = vpop.f32.mrb[20].mxu1  ;;  %1698 = vmatprep.subr.bf16.mxu0 %v1697_v62  ;;  %v1405_v62 = vld [vmem:[%s2790_s3 + $0x1d8] sm:$0xff] }
 0x681   :  { %v1506_v59 = vpop.f32.mrb[21].mxu1  ;;  %v1729_v47 = vpack.c.bf16 %v1405_v62, %v1403_v58 }
 0x682   :  { %v1507_v54 = vadd.f32 %v1506_v59, %v1505_v19  ;;  %v1703_v19 = vpack.c.bf16 %v1361_v11, %v1360_v49  ;;  %v1705_v59 = vpack.c.bf16 %v1379_v50, %v1378_v15  ;;  %v1407_v50 = vld [vmem:[%s2790_s3 + $0x1e8] sm:$0xff] }
 0x683   :  { %1700 = vmatpush3.bf16.msra.mxu0 %v1699_v48  ;;  %v1731_v48 = vpack.c.bf16 %v1404_v5, %v1402_v3 }
 0x684   :  { %v2477_v61 = vadd.f32 %v1507_v54, %v2192_v1  ;;  %v795_v1 = vrot.slane %v1341_v12, %v1907_v53  ;;  %1702 = vmatprep.subr.bf16.mxu0 %v1701_v8  ;;  %v1362_v54 = vld [vmem:[%s2794_s5 + $0x240] sm:$0xff] }
 0x686   :  { %1344 = vmatmul.mubr.msk.f32.gmra.mrb[16].mxu0 %vm168_vm1, %v2477_v61 }
 0x687   :  { %896 = vmatprep.mubr.f32.mxu0 %v1760_v33  ;;  %1704 = vmatpush3.bf16.msra.mxu0 %v1703_v19  ;;  %v1409_v19 = vld [vmem:[%s2790_s3 + $0x1f8] sm:$0xff] }
 0x688   :  { %v1508_v2 = vpop.f32.mrb[22].mxu1  ;;  %1706 = vmatprep.subr.bf16.mxu0 %v1705_v59  ;;  %v1733_v59 = vpack.c.bf16 %v1409_v19, %v1407_v50 }
 0x689   :  { %v1509_v7 = vpop.f32.mrb[23].mxu1 }
 0x68a   :  { %v1510_v60 = vadd.f32 %v1509_v7, %v1508_v2  ;;  %v1363_v2 = vld [vmem:[%s2794_s5 + $0x248] sm:$0xff]  ;;  %v1380_v7 = vld [vmem:[%s2794_s5 + $0x2d0] sm:$0xff] }
 0x68b   :  { %v1707_v12 = vpack.c.bf16 %v1363_v2, %v1362_v54  ;;  %v1406_v54 = vld [vmem:[%s2790_s3 + $0x1e0] sm:$0xff] }
 0x68c   :  { %v2483_v21 = vadd.f32 %v1510_v60, %v2198_v6  ;;  %v1381_v60 = vld [vmem:[%s2794_s5 + $0x2d8] sm:$0xff] }
 0x68d   :  { %1708 = vmatpush3.bf16.msra.mxu0 %v1707_v12 }
 0x68e   :  { %1345 = vmatmul.mubr.msk.f32.gmra.mrb[18].mxu0 %vm168_vm1, %v2483_v21 }
 0x74d   :  { %v880_v24 = vpop.f32.mrb[12].mxu0 }
 0x74e   :  { %v2492_v25 = vadd.f32 %v880_v24, %v795_v1  ;;  %v882_v26 = vpop.f32.mrb[13].mxu0  ;;  %v1365_v24 = vld [vmem:[%s2794_s5 + $0x258] sm:$0xff] }
 0x74f   :  { %v2494_v27 = vadd.f32 %v882_v26, %v799_v23  ;;  %v1382_v26 = vld [vmem:[%s2794_s5 + $0x2e0] sm:$0xff] }
 0x750   :  { %903 = vst [vmem:[%s2793_s6 + $0x20] sm:$0xff] %v2492_v25 }
 0x751   :  { %904 = vst [vmem:[%s2793_s6 + $0x28] sm:$0xff] %v2494_v27  ;;  %v886_v6 = vpop.f32.mrb[14].mxu0  ;;  %vm911_vm11 = vcmp.ge.f32.partialorder %v2492_v25, %v2494_v27 }
 0x752   :  { %v2506_v28 = vadd.f32 %v886_v6, %v795_v1  ;;  %v888_v29 = vpop.f32.mrb[15].mxu0  ;;  %v912_v30 = vsel %vm911_vm11, %v2492_v25, %v2494_v27  ;;  %v1383_v6 = vld [vmem:[%s2794_s5 + $0x2e8] sm:$0xff]  ;;  %v913_v41 = vsel %vm911_vm11, %v2089_v14, %v2092_v16 }
 0x753   :  { %v2513_v31 = vadd.f32 %v888_v29, %v799_v23  ;;  %914 = vmax.index.xlane.f32.xlu1 %v912_v30  ;;  %v1713_v30 = vpack.c.bf16 %v1383_v6, %v1382_v26 }
 0x754   :  { %905 = vst [vmem:[%s2793_s6 + $0x60] sm:$0xff] %v2506_v28 }
 0x755   :  { %906 = vst [vmem:[%s2793_s6 + $0x68] sm:$0xff] %v2513_v31  ;;  %vm919_vm12 = vcmp.ge.f32.partialorder %v2506_v28, %v2513_v31 }
 0x756   :  { %v920_v13 = vsel %vm919_vm12, %v2506_v28, %v2513_v31  ;;  %v921_v42 = vsel %vm919_vm12, %v2089_v14, %v2092_v16  ;;  %v1395_v28 = vld [vmem:[%s2790_s3 + $0x188] sm:$0xff]  ;;  %v1397_v31 = vld [vmem:[%s2790_s3 + $0x198] sm:$0xff] }
 0x757   :  { %922 = vmax.index.xlane.f32.xlu0 %v920_v13  ;;  %v1366_v13 = vld [vmem:[%s2794_s5 + $0x260] sm:$0xff] }
 0x759   :  { %v892_v17 = vpop.f32.mrb[16].mxu0 }
 0x75a   :  { %v2530_v18 = vadd.f32 %v892_v17, %v795_v1  ;;  %v894_v20 = vpop.f32.mrb[17].mxu0  ;;  %v1367_v17 = vld [vmem:[%s2794_s5 + $0x268] sm:$0xff] }
 0x75b   :  { %v2532_v63 = vadd.f32 %v894_v20, %v799_v23  ;;  %v1384_v20 = vld [vmem:[%s2794_s5 + $0x2f0] sm:$0xff] }
 0x75c   :  { %907 = vst [vmem:[%s2793_s6 + $0xa0] sm:$0xff] %v2530_v18 }
 0x75d   :  { %908 = vst [vmem:[%s2793_s6 + $0xa8] sm:$0xff] %v2532_v63  ;;  %vm927_vm13 = vcmp.ge.f32.partialorder %v2530_v18, %v2532_v63 }
 0x75e   :  { %v928_v4 = vsel %vm927_vm13, %v2530_v18, %v2532_v63  ;;  %v929_v44 = vsel %vm927_vm13, %v2089_v14, %v2092_v16  ;;  %v1394_v18 = vld [vmem:[%s2790_s3 + $0x180] sm:$0xff]  ;;  %v1721_v63 = vpack.c.bf16 %v1397_v31, %v1395_v28 }
 0x75f   :  { %930 = vmax.index.xlane.f32.xlu1 %v928_v4  ;;  %v1385_v4 = vld [vmem:[%s2794_s5 + $0x2f8] sm:$0xff]  ;;  %v1723_v46 = vpack.c.bf16 %v1396_v45, %v1394_v18 }
 0x760   :  { %1722 = vmatprep.subr.bf16.mxu1 %v1721_v63 }
 0x761   :  { %v898_v32 = vpop.f32.mrb[18].mxu0  ;;  %1724 = vmatpush1.bf16.msra.mxu1 %v1723_v46 }
 0x762   :  { %v2549_v9 = vadd.f32 %v898_v32, %v795_v1  ;;  %v900_v22 = vpop.f32.mrb[19].mxu0  ;;  %v1709_v1 = vpack.c.bf16 %v1381_v60, %v1380_v7  ;;  %v1715_v32 = vpack.c.bf16 %v1367_v17, %v1366_v13 }
 0x763   :  { %v2551_v34 = vadd.f32 %v900_v22, %v799_v23  ;;  %v1364_v23 = vld [vmem:[%s2794_s5 + $0x250] sm:$0xff]  ;;  %v1717_v22 = vpack.c.bf16 %v1385_v4, %v1384_v20 }
 0x764   :  { %909 = vst [vmem:[%s2793_s6 + $0xe0] sm:$0xff] %v2549_v9  ;;  %v1711_v29 = vpack.c.bf16 %v1365_v24, %v1364_v23  ;;  %1710 = vmatprep.subr.bf16.mxu0 %v1709_v1 }
 0x765   :  { %910 = vst [vmem:[%s2793_s6 + $0xe8] sm:$0xff] %v2551_v34  ;;  %vm935_vm14 = vcmp.ge.f32.partialorder %v2549_v9, %v2551_v34 }
 0x766   :  { %v936_v36 = vsel %vm935_vm14, %v2549_v9, %v2551_v34  ;;  %1712 = vmatpush3.bf16.msra.mxu0 %v1711_v29  ;;  %v937_v27 = vsel %vm935_vm14, %v2089_v14, %v2092_v16  ;;  %v1399_v9 = vld [vmem:[%s2790_s3 + $0x1a8] sm:$0xff]  ;;  %v1401_v34 = vld [vmem:[%s2790_s3 + $0x1b8] sm:$0xff] }
 0x767   :  { %938 = vmax.index.xlane.f32.xlu1 %v936_v36  ;;  %1714 = vmatprep.subr.bf16.mxu0 %v1713_v30  ;;  %v1368_v36 = vld [vmem:[%s2794_s5 + $0x270] sm:$0xff]  ;;  %v1725_v52 = vpack.c.bf16 %v1401_v34, %v1399_v9 }
 0x768   :  { %v1719_v38 = vpack.c.bf16 %v1369_v37, %v1368_v36 }
 0x769   :  { %1726 = vmatprep.subr.bf16.mxu1 %v1725_v52 }
 0x76a   :  { %1716 = vmatpush3.bf16.msra.mxu0 %v1715_v32  ;;  %1728 = vmatpush1.bf16.msra.mxu1 %v1727_v0 }
 0x76b   :  { %1718 = vmatprep.subr.bf16.mxu0 %v1717_v22  ;;  %1730 = vmatprep.subr.bf16.mxu1 %v1729_v47 }
 0x76e   :  { %1720 = vmatpush3.bf16.msra.mxu0 %v1719_v38  ;;  %1732 = vmatpush1.bf16.msra.mxu1 %v1731_v48 }
 0x76f   :  { %1734 = vmatprep.subr.bf16.mxu1 %v1733_v59 }
 0x7e0   :  { %v915_v39 = vpop.xlane.xlu1 %914 }
 0x7e1   :  { %1747 = vset.pattern.permute.xlu1 %v915_v39 }
 0x7e4   :  { %v923_v40 = vpop.xlane.xlu0 %922 }
 0x7e5   :  { %1748 = vset.pattern.permute.xlu0 %v923_v40  ;;  %917 = vperm.xlu1 %1747, %v913_v41  }
 0x7e9   :  { %925 = vperm.xlu0 %1748, %v921_v42  }
 0x7ec   :  { %v931_v43 = vpop.xlane.xlu1 %930 }
 0x7ed   :  { %1749 = vset.pattern.permute.xlu1 %v931_v43 }
 0x7f1   :  { %933 = vperm.xlu1 %1749, %v929_v44  }
 0x7f4   :  { %v939_v25 = vpop.xlane.xlu1 %938 }
 0x7f5   :  { %1751 = vset.pattern.permute.xlu0 %v939_v25  ;;  %1750 = vset.pattern.permute.xlu1 %v939_v25 }
 0x7f9   :  { %941 = vperm.xlu1 %1750, %v937_v27  }
 0x864   :  { %v918_v8 = vpop.permute.xlu1 %917 }
 0x865   :  { %vm943_vm15 = vcmp.eq.s32.totalorder %v2089_v14, %v918_v8  ;;  %vm944_vm0 = vcmp.eq.s32.totalorder %v2092_v16, %v918_v8 }
 0x866   :  { %1386 = vmatprep.mubr.msk.f32.mxu0 %vm944_vm0, %v1761_v35 }
 0x867   :  { %1387 = vmatmul.mubr.msk.f32.vlgmr.msra.gmra.mrb[20].mxu0 %vm943_vm15, %v1761_v35 }
 0x868   :  { %v926_v49 = vpop.permute.xlu0 %925 }
 0x869   :  { %vm945_vm2 = vcmp.eq.s32.totalorder %v2089_v14, %v926_v49  ;;  %vm946_vm3 = vcmp.eq.s32.totalorder %v2092_v16, %v926_v49 }
 0x86a   :  { %1388 = vmatprep.mubr.msk.f32.mxu0 %vm946_vm3, %v1761_v35 }
 0x86b   :  { %1389 = vmatmul.mubr.msk.f32.gmra.mrb[22].mxu0 %vm945_vm2, %v1761_v35 }
 0x870   :  { %v934_v11 = vpop.permute.xlu1 %933 }
 0x871   :  { %vm947_vm4 = vcmp.eq.s32.totalorder %v2089_v14, %v934_v11  ;;  %vm948_vm5 = vcmp.eq.s32.totalorder %v2092_v16, %v934_v11 }
 0x872   :  { %1390 = vmatprep.mubr.msk.f32.mxu0 %vm948_vm5, %v1761_v35 }
 0x873   :  { %1391 = vmatmul.mubr.msk.f32.gmra.mrb[24].mxu0 %vm947_vm4, %v1761_v35 }
 0x878   :  { %v942_v15 = vpop.permute.xlu1 %941 }
 0x879   :  { %vm949_vm6 = vcmp.eq.s32.totalorder %v2089_v14, %v942_v15  ;;  %vm950_vm7 = vcmp.eq.s32.totalorder %v2092_v16, %v942_v15  ;;  %v1408_v14 = vld [vmem:[%s2790_s3 + $0x1f0] sm:$0xff] }
 0x87a   :  { %1392 = vmatprep.mubr.msk.f32.mxu0 %vm950_vm7, %v1761_v35  ;;  %v1735_v16 = vpack.c.bf16 %v1408_v14, %v1406_v54 }
 0x87b   :  { %1393 = vmatmul.mubr.msk.f32.gmra.mrb[26].mxu0 %vm949_vm6, %v1761_v35 }
 0x87c   :  { %1736 = vmatpush1.bf16.msra.mxu1 %v1735_v16 }
 0x93a   :  { %v1543_v35 = vpop.f32.mrb[20].mxu0 }
 0x93b   :  { %v1544_v2 = vpop.f32.mrb[21].mxu0 }
 0x93c   :  { %v1545_v7 = vadd.f32 %v1544_v2, %v1543_v35 }
 0x93e   :  { %v1085_v60 = vadd.f32 %v1545_v7, %v2465_v10  ;;  %v1546_v12 = vpop.f32.mrb[22].mxu0 }
 0x93f   :  { %v1547_v1 = vpop.f32.mrb[23].mxu0 }
 0x940   :  { %v1548_v23 = vadd.f32 %v1547_v1, %v1546_v12  ;;  %1411 = vmatmul.mubr.msk.f32.vlgmr.msra.gmra.mrb[24].mxu1 %vm168_vm1, %v1085_v60 }
 0x941   :  { %1201 = vmatprep.mubr.f32.mxu1 %v1760_v33 }
 0x942   :  { %v1086_v24 = vadd.f32 %v1548_v23, %v2471_v51  ;;  %v1410_v51 = vld [vmem:[%s2792_s4 + $0x6] sm:$0x3] }
 0x943   :  { %v1112_v4 = vrot.slane %v1410_v51, %v1907_v53  ;;  %v1116_v32 = vrot.slane %v1410_v51, %v1912_v55 }
 0x944   :  { %1412 = vmatmul.mubr.msk.f32.gmra.mrb[26].mxu1 %vm168_vm1, %v1086_v24 }
 0x945   :  { %1207 = vmatprep.mubr.f32.mxu1 %v1760_v33 }
 0x946   :  { %v1549_v26 = vpop.f32.mrb[24].mxu0 }
 0x947   :  { %v1550_v6 = vpop.f32.mrb[25].mxu0 }
 0x948   :  { %v1551_v29 = vadd.f32 %v1550_v6, %v1549_v26 }
 0x94a   :  { %v1087_v30 = vadd.f32 %v1551_v29, %v2477_v61 }
 0x94c   :  { %1413 = vmatmul.mubr.msk.f32.gmra.mrb[28].mxu1 %vm168_vm1, %v1087_v30 }
 0x94d   :  { %1213 = vmatprep.mubr.f32.mxu1 %v1760_v33 }
 0x94e   :  { %v1552_v10 = vpop.f32.mrb[26].mxu0 }
 0x94f   :  { %v1553_v13 = vpop.f32.mrb[27].mxu0 }
 0x950   :  { %v1554_v17 = vadd.f32 %v1553_v13, %v1552_v10 }
 0x952   :  { %v1088_v20 = vadd.f32 %v1554_v17, %v2483_v21 }
 0x954   :  { %1414 = vmatmul.mubr.msk.f32.gmra.mrb[30].mxu1 %vm168_vm1, %v1088_v20 }
 0xa13   :  { %v1197_v61 = vpop.f32.mrb[24].mxu1 }
 0xa14   :  { %v1198_v22 = vadd.f32 %v1197_v61, %v1112_v4  ;;  %v1199_v36 = vpop.f32.mrb[25].mxu1 }
 0xa15   :  { %v1200_v37 = vadd.f32 %v1199_v36, %v1116_v32 }
 0xa16   :  { %1220 = vst [vmem:[%s2793_s6 + $0x30] sm:$0xff] %v1198_v22 }
 0xa17   :  { %1221 = vst [vmem:[%s2793_s6 + $0x38] sm:$0xff] %v1200_v37  ;;  %v1203_v33 = vpop.f32.mrb[26].mxu1 }
 0xa18   :  { %v1204_v21 = vadd.f32 %v1203_v33, %v1112_v4  ;;  %v1205_v38 = vpop.f32.mrb[27].mxu1 }
 0xa19   :  { %v1206_v39 = vadd.f32 %v1205_v38, %v1116_v32 }
 0xa1a   :  { %1222 = vst [vmem:[%s2793_s6 + $0x70] sm:$0xff] %v1204_v21 }
 0xa1b   :  { %1223 = vst [vmem:[%s2793_s6 + $0x78] sm:$0xff] %v1206_v39 }
 0xa1f   :  { %v1209_v53 = vpop.f32.mrb[28].mxu1 }
 0xa20   :  { %v1210_v55 = vadd.f32 %v1209_v53, %v1112_v4  ;;  %v1211_v40 = vpop.f32.mrb[29].mxu1 }
 0xa21   :  { %v1212_v41 = vadd.f32 %v1211_v40, %v1116_v32 }
 0xa22   :  { %1224 = vst [vmem:[%s2793_s6 + $0xb0] sm:$0xff] %v1210_v55 }
 0xa23   :  { %1225 = vst [vmem:[%s2793_s6 + $0xb8] sm:$0xff] %v1212_v41 }
 0xa27   :  { %v1215_v42 = vpop.f32.mrb[30].mxu1 }
 0xa28   :  { %v1216_v43 = vadd.f32 %v1215_v42, %v1112_v4  ;;  %v1217_v44 = vpop.f32.mrb[31].mxu1 }
 0xa29   :  { %v1218_v25 = vadd.f32 %v1217_v44, %v1116_v32 }
 0xa2a   :  { %1226 = vst [vmem:[%s2793_s6 + $0xf0] sm:$0xff] %v1216_v43 }
 0xa2b   :  { %1227 = vst [vmem:[%s2793_s6 + $0xf8] sm:$0xff] %v1218_v25 }

</bundles_post_ra>
